<compile_context>
chip_gen: v6e
topology: v6e:2x2x1
jax: 0.10.0
libtpu: 0.0.40
codegen_flags: <defaults>
</compile_context>

<pallas_src>
import jax
import jax.numpy as jnp
from jax.experimental import pallas as pl
from jax.experimental.pallas import tpu as pltpu

STATE_DIM = 32
HIDDEN = 256
ACTION_DIM = 8
OUT_PAD = 128      # lane-dense padded output width (>= ACTION_DIM, multiple of 128)
TM_MAX = 1024      # max rows of the batch processed per grid step


def _pick_act_dtype():
    # bf16 VPU/EUP exist on v6e / v7x; keep f32 activation math on older chips.
    try:
        kind = jax.devices()[0].device_kind.lower()
    except Exception:
        return jnp.float32
    if ("v6" in kind) or ("v7" in kind) or ("7x" in kind):
        return jnp.bfloat16
    return jnp.float32


ACT_DTYPE = _pick_act_dtype()


def mlp_kernel(x_ref, w1_ref, b1_ref, w2_ref, b2_ref, w3_ref, b3_ref,
               w4_ref, b4_ref, o_ref):
    def hidden_layer(h, w_ref, b_ref):
        # MXU matmul with f32 accumulation; bias + activation in b_ref.dtype
        # (bf16 on v6e/v7x, f32 on older chips).
        z = jnp.dot(h, w_ref[...], preferred_element_type=jnp.float32)
        z = z.astype(b_ref.dtype) + b_ref[...]
        # sigmoid(x) = 0.5 * tanh(0.5 * x) + 0.5  -> a single EUP op per element.
        return (0.5 * jnp.tanh(0.5 * z) + 0.5).astype(jnp.bfloat16)

    h = hidden_layer(x_ref[...], w1_ref, b1_ref)
    h = hidden_layer(h, w2_ref, b2_ref)
    h = hidden_layer(h, w3_ref, b3_ref)
    # Output layer: lane-dense (TM, OUT_PAD), no activation; bias add in f32.
    y = jnp.dot(h, w4_ref[...], preferred_element_type=jnp.float32) + b4_ref[...]
    o_ref[...] = y.astype(o_ref.dtype)


def prepare_params(params, act_dtype=ACT_DTYPE):
    """One-time weight prep (hoisted out of the per-call forward path)."""
    (w1, b1), (w2, b2), (w3, b3), (w4, b4) = params
    bf = lambda a: a.astype(jnp.bfloat16)
    w4p = jnp.zeros((HIDDEN, OUT_PAD), jnp.bfloat16).at[:, :ACTION_DIM].set(bf(w4))
    b4p = jnp.zeros((1, OUT_PAD), jnp.float32).at[:, :ACTION_DIM].set(
        b4.astype(jnp.float32))
    return ((bf(w1), b1.astype(act_dtype)),
            (bf(w2), b2.astype(act_dtype)),
            (bf(w3), b3.astype(act_dtype)),
            (w4p, b4p))


def _tile_rows(batch):
    """Row tile: large (amortize ~0.35us/step overhead, cap TM_MAX), multiple of 8,
    but keep >= 2 tiles when the batch allows so the parallel grid axis can shard
    across v7x's two TensorCores."""
    if batch <= 8:
        tm = 8
    else:
        half = -(-batch // 2)                     # ceil(batch / 2)
        tm = min(TM_MAX, ((half + 7) // 8) * 8)   # round up to sublane multiple
    padded = -(-batch // tm) * tm
    return tm, padded


@jax.jit
def nn_forward(x, prepped):
    (w1, b1), (w2, b2), (w3, b3), (w4p, b4p) = prepped
    batch = x.shape[0]
    tm, padded = _tile_rows(batch)
    n_tiles = padded // tm

    xp = x.astype(jnp.bfloat16)
    if padded != batch:
        xp = jnp.zeros((padded, STATE_DIM), jnp.bfloat16).at[:batch].set(xp)

    # Weights/biases: constant block index -> DMA'd once, VMEM-resident across grid.
    def const(shp):
        return pl.BlockSpec(shp, lambda i: tuple(0 for _ in shp))

    flops = 2 * padded * (STATE_DIM * HIDDEN + 2 * HIDDEN * HIDDEN + HIDDEN * OUT_PAD)
    transcendentals = 3 * padded * HIDDEN          # one tanh per hidden element/layer
    bytes_accessed = (
        xp.size * 2
        + (w1.size + w2.size + w3.size + w4p.size) * 2
        + (b1.size + b2.size + b3.size) * b1.dtype.itemsize
        + b4p.size * 4
        + padded * OUT_PAD * 2)                    # bf16 output slab

    out = pl.pallas_call(
        mlp_kernel,
        out_shape=jax.ShapeDtypeStruct((padded, OUT_PAD), jnp.bfloat16),
        grid_spec=pltpu.PrefetchScalarGridSpec(
            num_scalar_prefetch=0,
            grid=(n_tiles,),
            in_specs=[
                pl.BlockSpec((tm, STATE_DIM), lambda i: (i, 0)),
                const(w1.shape), const(b1.shape),
                const(w2.shape), const(b2.shape),
                const(w3.shape), const(b3.shape),
                const(w4p.shape), const(b4p.shape),
            ],
            out_specs=pl.BlockSpec((tm, OUT_PAD), lambda i: (i, 0)),
        ),
        compiler_params=pltpu.CompilerParams(
            dimension_semantics=("parallel",)),
        cost_estimate=pl.CostEstimate(
            flops=flops,
            transcendentals=transcendentals,
            bytes_accessed=bytes_accessed),
    )(xp, w1, b1, w2, b2, w3, b3, w4p, b4p)

    # Slice away batch / lane padding; restore f32 output semantics of the module.
    return out[:batch, :ACTION_DIM].astype(jnp.float32)


def init_params(key):
    """Deterministic PyTorch-style init: U(-1/sqrt(fan_in), 1/sqrt(fan_in))."""
    dims = [(STATE_DIM, HIDDEN), (HIDDEN, HIDDEN), (HIDDEN, HIDDEN), (HIDDEN, ACTION_DIM)]
    params = []
    for (fan_in, fan_out) in dims:
        key, kw, kb = jax.random.split(key, 3)
        bound = 1.0 / jnp.sqrt(fan_in)
        w = jax.random.uniform(kw, (fan_in, fan_out), jnp.float32, -bound, bound)
        b = jax.random.uniform(kb, (1, fan_out), jnp.float32, -bound, bound)
        params.append((w, b))
    return params


def reference_forward(x, params):
    """Pure-f32 JAX reference (exact module semantics)."""
    h = x
    for i, (w, b) in enumerate(params):
        h = jnp.dot(h, w, preferred_element_type=jnp.float32) + b
        if i < len(params) - 1:
            h = jax.nn.sigmoid(h)
    return h


def reference_forward_quantized(x, prepped):
    """Pure-JAX reference mirroring the kernel's exact dtypes / tanh formulation."""
    (w1, b1), (w2, b2), (w3, b3), (w4p, b4p) = prepped
    h = x.astype(jnp.bfloat16)
    for w, b in ((w1, b1), (w2, b2), (w3, b3)):
        z = jnp.dot(h, w, preferred_element_type=jnp.float32)
        z = z.astype(b.dtype) + b
        h = (0.5 * jnp.tanh(0.5 * z) + 0.5).astype(jnp.bfloat16)
    y = jnp.dot(h, w4p, preferred_element_type=jnp.float32) + b4p
    y = y.astype(jnp.bfloat16).astype(jnp.float32)
    return y[:, :ACTION_DIM]


if __name__ == "__main__":
    key = jax.random.PRNGKey(0)
    key, kx = jax.random.split(key)
    # Multiple rows per call so the MXU rows are actually used (256 -> 2 row tiles).
    batch = 256
    x = jax.random.normal(kx, (batch, STATE_DIM), jnp.float32)
    params = init_params(key)
    prepped = prepare_params(params)   # one-time: bf16 weights, padded final layer

    y = nn_forward(x, prepped)
    jax.block_until_ready(y)
    assert y.shape == (batch, ACTION_DIM)
    assert y.dtype == jnp.float32

    # Reference mirroring the kernel's bf16 operand / activation / output rounding.
    y_q = reference_forward_quantized(x, prepped)
    assert jnp.allclose(y, y_q, atol=1e-2, rtol=1e-2), \
        float(jnp.max(jnp.abs(y - y_q)))

    # Sanity vs. full-f32 reference (loose tolerance covers bf16 quantization).
    y_f32 = reference_forward(x, params)
    assert jnp.allclose(y, y_f32, atol=7e-2, rtol=7e-2), \
        float(jnp.max(jnp.abs(y - y_f32)))

    print("KERNEL_OK")
</pallas_src>

<mosaic_0001>
module attributes {stable_mosaic.version = 11 : i64} {
  func.func @mlp_kernel(%arg0: i32, %arg1: memref<128x32xbf16, #tpu.memory_space<vmem>>, %arg2: memref<32x256xbf16, #tpu.memory_space<vmem>>, %arg3: memref<1x256xf32, #tpu.memory_space<vmem>>, %arg4: memref<256x256xbf16, #tpu.memory_space<vmem>>, %arg5: memref<1x256xf32, #tpu.memory_space<vmem>>, %arg6: memref<256x256xbf16, #tpu.memory_space<vmem>>, %arg7: memref<1x256xf32, #tpu.memory_space<vmem>>, %arg8: memref<256x128xbf16, #tpu.memory_space<vmem>>, %arg9: memref<1x128xf32, #tpu.memory_space<vmem>>, %arg10: memref<128x128xbf16, #tpu.memory_space<vmem>>) attributes {dimension_semantics = [#tpu.dimension_semantics<parallel>], iteration_bounds = array<i64: 2>, scalar_prefetch = 0 : i64, scratch_operands = 0 : i64, tpu.core_type = #tpu.core_type<tc>, window_params = [{transform_indices = @transform_0, window_bounds = array<i64: 128, 32>}, {pipeline_mode = #tpu.pipeline_mode<synchronous>, transform_indices = @transform_1, window_bounds = array<i64: 32, 256>}, {pipeline_mode = #tpu.pipeline_mode<synchronous>, transform_indices = @transform_2, window_bounds = array<i64: 1, 256>}, {pipeline_mode = #tpu.pipeline_mode<synchronous>, transform_indices = @transform_3, window_bounds = array<i64: 256, 256>}, {pipeline_mode = #tpu.pipeline_mode<synchronous>, transform_indices = @transform_4, window_bounds = array<i64: 1, 256>}, {pipeline_mode = #tpu.pipeline_mode<synchronous>, transform_indices = @transform_5, window_bounds = array<i64: 256, 256>}, {pipeline_mode = #tpu.pipeline_mode<synchronous>, transform_indices = @transform_6, window_bounds = array<i64: 1, 256>}, {pipeline_mode = #tpu.pipeline_mode<synchronous>, transform_indices = @transform_7, window_bounds = array<i64: 256, 128>}, {pipeline_mode = #tpu.pipeline_mode<synchronous>, transform_indices = @transform_8, window_bounds = array<i64: 1, 128>}, {transform_indices = @transform_9, window_bounds = array<i64: 128, 128>}]} {
    %c0 = arith.constant 0 : index
    %c0_0 = arith.constant 0 : index
    %0 = vector.load %arg1[%c0, %c0_0] : memref<128x32xbf16, #tpu.memory_space<vmem>>, vector<128x32xbf16>
    %c0_1 = arith.constant 0 : index
    %c0_2 = arith.constant 0 : index
    %1 = vector.load %arg2[%c0_1, %c0_2] : memref<32x256xbf16, #tpu.memory_space<vmem>>, vector<32x256xbf16>
    %cst = arith.constant dense<0.000000e+00> : vector<128x256xf32>
    %2 = tpu.matmul %0, %1, %cst {dimension_numbers = #tpu.dot_dimension_numbers<[1], [0], [0], [1], [0, 0, 1, 1], [], []>} : vector<128x32xbf16>, vector<32x256xbf16>, vector<128x256xf32> -> vector<128x256xf32>
    %c0_3 = arith.constant 0 : index
    %c0_4 = arith.constant 0 : index
    %3 = vector.load %arg3[%c0_3, %c0_4] : memref<1x256xf32, #tpu.memory_space<vmem>>, vector<1x256xf32>
    %4 = vector.broadcast %3 : vector<1x256xf32> to vector<128x256xf32>
    %5 = arith.addf %2, %4 : vector<128x256xf32>
    %cst_5 = arith.constant 5.000000e-01 : f32
    %6 = vector.broadcast %cst_5 : f32 to vector<128x256xf32>
    %7 = arith.mulf %6, %5 : vector<128x256xf32>
    %8 = math.tanh %7 : vector<128x256xf32>
    %cst_6 = arith.constant 5.000000e-01 : f32
    %9 = vector.broadcast %cst_6 : f32 to vector<128x256xf32>
    %10 = arith.mulf %9, %8 : vector<128x256xf32>
    %cst_7 = arith.constant 5.000000e-01 : f32
    %11 = vector.broadcast %cst_7 : f32 to vector<128x256xf32>
    %12 = arith.addf %10, %11 : vector<128x256xf32>
    %13 = arith.truncf %12 : vector<128x256xf32> to vector<128x256xbf16>
    %c0_8 = arith.constant 0 : index
    %c0_9 = arith.constant 0 : index
    %14 = vector.load %arg4[%c0_8, %c0_9] : memref<256x256xbf16, #tpu.memory_space<vmem>>, vector<256x256xbf16>
    %cst_10 = arith.constant dense<0.000000e+00> : vector<128x256xf32>
    %15 = tpu.matmul %13, %14, %cst_10 {dimension_numbers = #tpu.dot_dimension_numbers<[1], [0], [0], [1], [0, 0, 1, 1], [], []>} : vector<128x256xbf16>, vector<256x256xbf16>, vector<128x256xf32> -> vector<128x256xf32>
    %c0_11 = arith.constant 0 : index
    %c0_12 = arith.constant 0 : index
    %16 = vector.load %arg5[%c0_11, %c0_12] : memref<1x256xf32, #tpu.memory_space<vmem>>, vector<1x256xf32>
    %17 = vector.broadcast %16 : vector<1x256xf32> to vector<128x256xf32>
    %18 = arith.addf %15, %17 : vector<128x256xf32>
    %cst_13 = arith.constant 5.000000e-01 : f32
    %19 = vector.broadcast %cst_13 : f32 to vector<128x256xf32>
    %20 = arith.mulf %19, %18 : vector<128x256xf32>
    %21 = math.tanh %20 : vector<128x256xf32>
    %cst_14 = arith.constant 5.000000e-01 : f32
    %22 = vector.broadcast %cst_14 : f32 to vector<128x256xf32>
    %23 = arith.mulf %22, %21 : vector<128x256xf32>
    %cst_15 = arith.constant 5.000000e-01 : f32
    %24 = vector.broadcast %cst_15 : f32 to vector<128x256xf32>
    %25 = arith.addf %23, %24 : vector<128x256xf32>
    %26 = arith.truncf %25 : vector<128x256xf32> to vector<128x256xbf16>
    %c0_16 = arith.constant 0 : index
    %c0_17 = arith.constant 0 : index
    %27 = vector.load %arg6[%c0_16, %c0_17] : memref<256x256xbf16, #tpu.memory_space<vmem>>, vector<256x256xbf16>
    %cst_18 = arith.constant dense<0.000000e+00> : vector<128x256xf32>
    %28 = tpu.matmul %26, %27, %cst_18 {dimension_numbers = #tpu.dot_dimension_numbers<[1], [0], [0], [1], [0, 0, 1, 1], [], []>} : vector<128x256xbf16>, vector<256x256xbf16>, vector<128x256xf32> -> vector<128x256xf32>
    %c0_19 = arith.constant 0 : index
    %c0_20 = arith.constant 0 : index
    %29 = vector.load %arg7[%c0_19, %c0_20] : memref<1x256xf32, #tpu.memory_space<vmem>>, vector<1x256xf32>
    %30 = vector.broadcast %29 : vector<1x256xf32> to vector<128x256xf32>
    %31 = arith.addf %28, %30 : vector<128x256xf32>
    %cst_21 = arith.constant 5.000000e-01 : f32
    %32 = vector.broadcast %cst_21 : f32 to vector<128x256xf32>
    %33 = arith.mulf %32, %31 : vector<128x256xf32>
    %34 = math.tanh %33 : vector<128x256xf32>
    %cst_22 = arith.constant 5.000000e-01 : f32
    %35 = vector.broadcast %cst_22 : f32 to vector<128x256xf32>
    %36 = arith.mulf %35, %34 : vector<128x256xf32>
    %cst_23 = arith.constant 5.000000e-01 : f32
    %37 = vector.broadcast %cst_23 : f32 to vector<128x256xf32>
    %38 = arith.addf %36, %37 : vector<128x256xf32>
    %39 = arith.truncf %38 : vector<128x256xf32> to vector<128x256xbf16>
    %c0_24 = arith.constant 0 : index
    %c0_25 = arith.constant 0 : index
    %40 = vector.load %arg8[%c0_24, %c0_25] : memref<256x128xbf16, #tpu.memory_space<vmem>>, vector<256x128xbf16>
    %cst_26 = arith.constant dense<0.000000e+00> : vector<128x128xf32>
    %41 = tpu.matmul %39, %40, %cst_26 {dimension_numbers = #tpu.dot_dimension_numbers<[1], [0], [0], [1], [0, 0, 1, 1], [], []>} : vector<128x256xbf16>, vector<256x128xbf16>, vector<128x128xf32> -> vector<128x128xf32>
    %c0_27 = arith.constant 0 : index
    %c0_28 = arith.constant 0 : index
    %42 = vector.load %arg9[%c0_27, %c0_28] : memref<1x128xf32, #tpu.memory_space<vmem>>, vector<1x128xf32>
    %43 = vector.broadcast %42 : vector<1x128xf32> to vector<128x128xf32>
    %44 = arith.addf %41, %43 : vector<128x128xf32>
    %45 = arith.truncf %44 : vector<128x128xf32> to vector<128x128xbf16>
    %c0_29 = arith.constant 0 : index
    %c0_30 = arith.constant 0 : index
    %46 = vector.load %arg10[%c0_29, %c0_30] : memref<128x128xbf16, #tpu.memory_space<vmem>>, vector<128x128xbf16>
    tpu.vector_store %arg10[%c0_29, %c0_30], %45 {strides = array<i32>} : memref<128x128xbf16, #tpu.memory_space<vmem>>, vector<128x128xbf16>,
    return
  }
  func.func @transform_0(%arg0: i32) -> (i32, i32) {
    %c0_i32 = arith.constant 0 : i32
    %c0_i32_0 = arith.constant 0 : i32
    return %arg0, %c0_i32 : i32, i32
  }
  func.func @transform_1(%arg0: i32) -> (i32, i32) {
    %c0_i32 = arith.constant 0 : i32
    %c0_i32_0 = arith.constant 0 : i32
    %c0_i32_1 = arith.constant 0 : i32
    return %c0_i32, %c0_i32_0 : i32, i32
  }
  func.func @transform_2(%arg0: i32) -> (i32, i32) {
    %c0_i32 = arith.constant 0 : i32
    %c0_i32_0 = arith.constant 0 : i32
    %c0_i32_1 = arith.constant 0 : i32
    return %c0_i32, %c0_i32_0 : i32, i32
  }
  func.func @transform_3(%arg0: i32) -> (i32, i32) {
    %c0_i32 = arith.constant 0 : i32
    %c0_i32_0 = arith.constant 0 : i32
    %c0_i32_1 = arith.constant 0 : i32
    return %c0_i32, %c0_i32_0 : i32, i32
  }
  func.func @transform_4(%arg0: i32) -> (i32, i32) {
    %c0_i32 = arith.constant 0 : i32
    %c0_i32_0 = arith.constant 0 : i32
    %c0_i32_1 = arith.constant 0 : i32
    return %c0_i32, %c0_i32_0 : i32, i32
  }
  func.func @transform_5(%arg0: i32) -> (i32, i32) {
    %c0_i32 = arith.constant 0 : i32
    %c0_i32_0 = arith.constant 0 : i32
    %c0_i32_1 = arith.constant 0 : i32
    return %c0_i32, %c0_i32_0 : i32, i32
  }
  func.func @transform_6(%arg0: i32) -> (i32, i32) {
    %c0_i32 = arith.constant 0 : i32
    %c0_i32_0 = arith.constant 0 : i32
    %c0_i32_1 = arith.constant 0 : i32
    return %c0_i32, %c0_i32_0 : i32, i32
  }
  func.func @transform_7(%arg0: i32) -> (i32, i32) {
    %c0_i32 = arith.constant 0 : i32
    %c0_i32_0 = arith.constant 0 : i32
    %c0_i32_1 = arith.constant 0 : i32
    return %c0_i32, %c0_i32_0 : i32, i32
  }
  func.func @transform_8(%arg0: i32) -> (i32, i32) {
    %c0_i32 = arith.constant 0 : i32
    %c0_i32_0 = arith.constant 0 : i32
    %c0_i32_1 = arith.constant 0 : i32
    return %c0_i32, %c0_i32_0 : i32, i32
  }
  func.func @transform_9(%arg0: i32) -> (i32, i32) {
    %c0_i32 = arith.constant 0 : i32
    %c0_i32_0 = arith.constant 0 : i32
    return %arg0, %c0_i32 : i32, i32
  }
}

</mosaic_0001>

<bundles_post_ra>
// kernel: nn_forward.1
= control target key start
LH: loop header
LB: loop body
LE: loop exit
PB: predicated region body
PF: predicated region fallthrough
CT: control target
= control target key end

     0   :  { %14 = vsyncpa [#allocation3], 0  ;;  %s3249_s0 = inlined_call_operand.vmem [shape: bf16[256,32], index: 0, kind: input, shape index: {}]   ;;  %s3250_s1 = inlined_call_operand.hbm [shape: bf16[32,256], index: 1, kind: input, shape index: {}]   ;;  %s3251_s2 = inlined_call_operand.vmem [shape: f32[1,256], index: 2, kind: input, shape index: {}]   ;;  %s3252_s3 = inlined_call_operand.vmem [shape: bf16[256,256], index: 3, kind: input, shape index: {}]   ;;  %s3253_s4 = inlined_call_operand.vmem [shape: f32[1,256], index: 4, kind: input, shape index: {}]   ;;  %s3254_s5 = inlined_call_operand.hbm [shape: bf16[256,256], index: 5, kind: input, shape index: {}]   ;;  %s3255_s6 = inlined_call_operand.vmem [shape: f32[1,256], index: 6, kind: input, shape index: {}]   ;;  %s3256_s7 = inlined_call_operand.hbm [shape: bf16[256,128], index: 7, kind: input, shape index: {}]   ;;  %s3257_s8 = inlined_call_operand.vmem [shape: f32[1,128], index: 8, kind: input, shape index: {}]   ;;  %s3258_s9 = inlined_call_operand.vmem [shape: bf16[256,128], index: 9, kind: output, shape index: {}]  }
   0x1   :  { %15 = vsyncpa [#allocation5], 0  ;;  %s2867_s30 = smov 0  }
   0x2 LB: > { %s2076_s10 = sadd.s32 4294967295, %s2807_s30   ;;  %p2078_p0 = scmp.ge.s32.totalorder %s2807_s30, 1  ;;  %s2807_s30 = sphi %s2867_s30, %s21_s30  }
   0x3   : > { %p246_p1 = scmp.lt.s32.totalorder %s2807_s30, 3  ;;  %p2877_p2 = scmp.eq.s32.totalorder %s2076_s10, 0 }
   0x4   : > { %s2809_s13 = smov [#allocation4]   ;;  %s2810_s15 = smov [#allocation2]  }
   0x5   : > { %p2881_p3 = pnand %p2078_p0, %p246_p1  ;;  %s280_s14 = sshll.u32 %s2809_s13, 4  ;;  %s281_s14 = int_to_ptr.vmem [resolvable:$true] %s280_s14 }
   0x6   : > { %s258_s16 = sshll.u32 %s2810_s15, 4  ;;  %s2811_s18 = smov [#allocation6]   ;;  %s2887_s16 = int_to_ptr.vmem [resolvable:$true] %s258_s16 }
   0x7   : > { %p2365_p4 = pneg %p2881_p3  ;;  %s296_s19 = sshll.u32 %s2811_s18, 4  ;;  %s2895_s19 = int_to_ptr.vmem [resolvable:$true] %s296_s19 }
   0x8   : > { %s2726_s20 = scalar_lea.vmem %s281_s14, 4096  ;;  %p2734_p10 = scmp.lt.s32.totalorder %s281_s14, %s281_s14 }
   0x9   : > { %p2891_p5 = pnand %p2877_p2, %p2365_p4  ;;  %p2727_p7 = scmp.ne.s32.totalorder %s281_s14, %s2726_s20 }
   0xa   : > { %p2735_p11 = scmp.lt.s32.totalorder %s2726_s20, %s2726_s20 }
   0xb   : > { %p2717_p6 = pneg %p2891_p5 }
   0xc   : > { %p2736_p12 = por %p2735_p11, %p2734_p10 }
   0xd   : > { %p2729_p8 = pnand %p2727_p7, %p2717_p6 }
   0xf   : > { %p2730_p9 = pneg %p2729_p8 }
  0x11   : > { %p2737_p13 = pnand %p2736_p12, %p2730_p9 }
  0x13   : > { %2740 = shalt.err (!%p2737_p13)
}
  0x14   : > { %s2812_s21 = smov 128   ;;  %s2813_s22 = smov 8  }
  0x15   : > { %2371 = dma.hbm_to_vmem [thread:$0]  (!%p2891_p5), %s3254_s5, 4096, %s281_s14, [#allocation5], %s2812_s21, %s2812_s21, %s2813_s22  }
  0x16   : > { %s2752_s25 = scalar_lea.vmem %s2887_s16, 512  ;;  %p2760_p7 = scmp.lt.s32.totalorder %s2887_s16, %s2887_s16 }
  0x17   : > { %p2753_p0 = scmp.ne.s32.totalorder %s2887_s16, %s2752_s25  ;;  %p2761_p8 = scmp.lt.s32.totalorder %s2752_s25, %s2752_s25 }
  0x19   : > { %p2755_p1 = pnand %p2753_p0, %p2717_p6  ;;  %p2762_p9 = por %p2761_p8, %p2760_p7 }
  0x1b   : > { %p2756_p4 = pneg %p2755_p1 }
  0x1d   : > { %p2763_p10 = pnand %p2762_p9, %p2756_p4 }
  0x1f   : > { %2766 = shalt.err (!%p2763_p10)
}
  0x20   : > { %2368 = dma.hbm_to_vmem [thread:$0]  (!%p2891_p5), %s3250_s1, 512, %s2887_s16, [#allocation3], %s2812_s21, %s2812_s21, %s2813_s22  }
  0x21   : > { %s2778_s28 = scalar_lea.vmem %s2895_s19, 2048  ;;  %p2786_p0 = scmp.lt.s32.totalorder %s2895_s19, %s2895_s19 }
  0x22   : > { %p2779_p11 = scmp.ne.s32.totalorder %s2895_s19, %s2778_s28  ;;  %p2787_p1 = scmp.lt.s32.totalorder %s2778_s28, %s2778_s28 }
  0x24   : > { %p2781_p12 = pnand %p2779_p11, %p2717_p6  ;;  %p2788_p4 = por %p2787_p1, %p2786_p0 }
  0x26   : > { %p2782_p13 = pneg %p2781_p12 }
  0x28   : > { %p2789_p7 = pnand %p2788_p4, %p2782_p13 }
  0x2a   : > { %2792 = shalt.err (!%p2789_p7)
}
  0x2b   : > { %s2814_s29 = smov 64   ;;  %s2815_s13 = smov 4  }
  0x2c   : > { %2374 = dma.hbm_to_vmem [thread:$0]  (!%p2891_p5), %s3256_s7, 2048, %s2895_s19, [#allocation5], %s2814_s29, %s2814_s29, %s2815_s13  }
  0x2d   : > { %324 = sbr.rel (%p2881_p3) target bundleno = 997 (0x3e5), region = 56 }
  0x32   : > { %2798 = dma.done.wait (%p2877_p2), [#allocation3], 512  }
  0x33   : > { %2800 = vsyncadd (%p2877_p2), [#allocation3], 4294966784 }
  0x34   : > { %2802 = dma.done.wait (%p2877_p2), [#allocation5], 6144  }
  0x35   : > { %2804 = vsyncadd (%p2877_p2), [#allocation5], 4294961152  ;;  %s2087_s16 = sshll.u32 %s2076_s10, 4  ;;  %v2816_v0 = vmov 0   ;;  %v2397_v1 = vld [vmem:[#allocation2 + $0x14] ss:$8 sps:$4 sm:$0xff]   ;;  %v403_v59 = vlaneseq }
  0x36   : > { %530 = vmatprep.mubr.bf16.mxu0 %v2816_v0  ;;  %p369_p5 = scmp.lt.s32.totalorder %s2087_s16, 31  ;;  %v2399_v2 = vld [vmem:[#allocation2 + $0x10] ss:$8 sps:$4 sm:$0xff]   ;;  %510 = vmatprep.subr.bf16.mxu0 %v2397_v1  ;;  %v2400_v3 = vld [vmem:[#allocation2 + $0x4] ss:$8 sps:$4 sm:$0xff]   ;;  %vm473_vm0 = vcmask 261120  }
  0x37   : > { %511 = vmatpush1.bf16.msra.mxu0 %v2399_v2  ;;  %v2402_v4 = vld [vmem:[#allocation2] ss:$8 sps:$4 sm:$0xff]   ;;  %v2411_v6 = vld [vmem:[%s3252_s3 + $0x74] ss:$8 sps:$4 sm:$0xff]   ;;  %v2413_v7 = vld [vmem:[%s3252_s3 + $0x70] ss:$8 sps:$4 sm:$0xff]  }
  0x38   : > { %s3263_s16 = smov (!%p369_p5, %s2087_s16), 31  ;;  %512 = vmatprep.subr.bf16.mxu0 %v2400_v3  ;;  %v2414_v8 = vld [vmem:[%s3252_s3 + $0x64] ss:$8 sps:$4 sm:$0xff]   ;;  %959 = vmatprep.subr.bf16.mxu1 %v2411_v6  ;;  %v2416_v10 = vld [vmem:[%s3252_s3 + $0x60] ss:$8 sps:$4 sm:$0xff]   ;;  %v404_v62 = vshrl.u32 %v403_v59, 7 }
  0x39   : > { %s2088_s12 = sshll.u32 %s3263_s16, 2  ;;  %960 = vmatpush1.bf16.msra.mxu1 %v2413_v7  ;;  %v2417_v11 = vld [vmem:[%s3252_s3 + $0x54] ss:$8 sps:$4 sm:$0xff]   ;;  %v2419_v12 = vld [vmem:[%s3252_s3 + $0x50] ss:$8 sps:$4 sm:$0xff]  }
  0x3a   : > { %s2954_s11 = scalar_lea.vmem %s3249_s0, %s2088_s12  ;;  %961 = vmatprep.subr.bf16.mxu1 %v2414_v8  ;;  %v2420_v13 = vld [vmem:[%s3252_s3 + $0x44] ss:$8 sps:$4 sm:$0xff]   ;;  %v2422_v15 = vld [vmem:[%s3252_s3 + $0x40] ss:$8 sps:$4 sm:$0xff]   ;;  %v2423_v16 = vld [vmem:[%s3252_s3 + $0x34] ss:$8 sps:$4 sm:$0xff]   ;;  %s3222_s22 = scalar_lea.vmem %s3258_s9, %s2088_s12 }
  0x3b   : > { %v2403_v5 = vld [vmem:[%s2954_s11] sm:$0xff]   ;;  %513 = vmatpush1.bf16.msra.mxu0 %v2402_v4  ;;  %v2404_v9 = vld [vmem:[%s2954_s11 + $0x8] sm:$0xff]   ;;  %v2405_v14 = vld [vmem:[%s2954_s11 + $0x10] sm:$0xff]   ;;  %v3075_v1 = vsub.s32 0, %v404_v62  ;;  %v3080_v3 = vsub.s32 1, %v404_v62 }
  0x3c   : > { %v2425_v17 = vld [vmem:[%s3252_s3 + $0x30] ss:$8 sps:$4 sm:$0xff]   ;;  %v2426_v18 = vld [vmem:[%s3252_s3 + $0x24] ss:$8 sps:$4 sm:$0xff]   ;;  %v2428_v20 = vld [vmem:[%s3252_s3 + $0x20] ss:$8 sps:$4 sm:$0xff]  }
  0x3d   : > { %962 = vmatpush1.bf16.msra.mxu1 %v2416_v10  ;;  %v2406_v19 = vld [vmem:[%s2954_s11 + $0x18] sm:$0xff]   ;;  %v2432_v23 = vld [vmem:[%s3252_s3 + $0x4] ss:$8 sps:$4 sm:$0xff]   ;;  %v2434_v25 = vld [vmem:[%s3252_s3] ss:$8 sps:$4 sm:$0xff]  }
  0x3e   : > { %2103 = vmatmul.mubr.msk.bf16.vlgmr.msra.gmra.mxu0 %vm473_vm0, %v2403_v5  ;;  %963 = vmatprep.subr.bf16.mxu1 %v2417_v11  ;;  %v2429_v21 = vld [vmem:[%s3252_s3 + $0x14] ss:$8 sps:$4 sm:$0xff]   ;;  %v2431_v22 = vld [vmem:[%s3252_s3 + $0x10] ss:$8 sps:$4 sm:$0xff]   ;;  %v2407_v24 = vld [vmem:[%s2954_s11 + $0x20] sm:$0xff]  }
  0x3f   : > { %540 = vmatprep.mubr.bf16.mxu0 %v2816_v0  ;;  %v2408_v26 = vld [vmem:[%s2954_s11 + $0x28] sm:$0xff]   ;;  %v2409_v27 = vld [vmem:[%s2954_s11 + $0x30] sm:$0xff]   ;;  %v2410_v28 = vld [vmem:[%s2954_s11 + $0x38] sm:$0xff]  }
  0x40   : > { %v2435_v29 = vld [vmem:[%s3252_s3 + $0xf4] ss:$8 sps:$4 sm:$0xff]   ;;  %v2437_v30 = vld [vmem:[%s3252_s3 + $0xf0] ss:$8 sps:$4 sm:$0xff]   ;;  %v2438_v31 = vld [vmem:[%s3252_s3 + $0xe4] ss:$8 sps:$4 sm:$0xff]  }
  0x41   : > { %964 = vmatpush1.bf16.msra.mxu1 %v2419_v12  ;;  %v2440_v32 = vld [vmem:[%s3252_s3 + $0xe0] ss:$8 sps:$4 sm:$0xff]   ;;  %v2441_v33 = vld [vmem:[%s3252_s3 + $0xd4] ss:$8 sps:$4 sm:$0xff]   ;;  %v2443_v34 = vld [vmem:[%s3252_s3 + $0xd0] ss:$8 sps:$4 sm:$0xff]  }
  0x42   : > { %965 = vmatprep.subr.bf16.mxu1 %v2420_v13  ;;  %v2444_v35 = vld [vmem:[%s3252_s3 + $0xc4] ss:$8 sps:$4 sm:$0xff]   ;;  %v2446_v36 = vld [vmem:[%s3252_s3 + $0xc0] ss:$8 sps:$4 sm:$0xff]   ;;  %v2447_v37 = vld [vmem:[%s3252_s3 + $0xb4] ss:$8 sps:$4 sm:$0xff]  }
  0x43   : > { %v2449_v38 = vld [vmem:[%s3252_s3 + $0xb0] ss:$8 sps:$4 sm:$0xff]   ;;  %v2450_v39 = vld [vmem:[%s3252_s3 + $0xa4] ss:$8 sps:$4 sm:$0xff]   ;;  %v2452_v40 = vld [vmem:[%s3252_s3 + $0xa0] ss:$8 sps:$4 sm:$0xff]  }
  0x44   : > { %v2453_v41 = vld [vmem:[%s3252_s3 + $0x94] ss:$8 sps:$4 sm:$0xff]   ;;  %v2455_v42 = vld [vmem:[%s3252_s3 + $0x90] ss:$8 sps:$4 sm:$0xff]   ;;  %v2456_v43 = vld [vmem:[%s3252_s3 + $0x84] ss:$8 sps:$4 sm:$0xff]  }
  0x45   : > { %966 = vmatpush1.bf16.msra.mxu1 %v2422_v15  ;;  %v2458_v44 = vld [vmem:[%s3252_s3 + $0x80] ss:$8 sps:$4 sm:$0xff]   ;;  %v2459_v45 = vld [vmem:[#allocation4 + $0x70] ss:$8 sps:$4 sm:$0xff]   ;;  %v2461_v46 = vld [vmem:[#allocation4 + $0x74] ss:$8 sps:$4 sm:$0xff]  }
  0x46   : > { %2104 = vmatmul.mubr.msk.bf16.gmra.mxu0 %vm473_vm0, %v2404_v9  ;;  %967 = vmatprep.subr.bf16.mxu1 %v2423_v16  ;;  %v2464_v47 = vld [vmem:[#allocation4 + $0x64] ss:$8 sps:$4 sm:$0xff]   ;;  %v2462_v48 = vld [vmem:[#allocation4 + $0x60] ss:$8 sps:$4 sm:$0xff]   ;;  %v2467_v49 = vld [vmem:[#allocation4 + $0x54] ss:$8 sps:$4 sm:$0xff]  }
  0x47   : > { %550 = vmatprep.mubr.bf16.mxu0 %v2816_v0  ;;  %1420 = vmatprep.subr.bf16.mxu0 %v2461_v46  ;;  %v2465_v50 = vld [vmem:[#allocation4 + $0x50] ss:$8 sps:$4 sm:$0xff]   ;;  %v2470_v51 = vld [vmem:[#allocation4 + $0x44] ss:$8 sps:$4 sm:$0xff]   ;;  %v2468_v52 = vld [vmem:[#allocation4 + $0x40] ss:$8 sps:$4 sm:$0xff]  }
  0x48   : > { %1421 = vmatpush1.bf16.msra.mxu0 %v2459_v45  ;;  %v2473_v53 = vld [vmem:[#allocation4 + $0x34] ss:$8 sps:$4 sm:$0xff]   ;;  %v2471_v54 = vld [vmem:[#allocation4 + $0x30] ss:$8 sps:$4 sm:$0xff]   ;;  %v2476_v55 = vld [vmem:[#allocation4 + $0x24] ss:$8 sps:$4 sm:$0xff]  }
  0x49   : > { %968 = vmatpush1.bf16.msra.mxu1 %v2425_v17  ;;  %1422 = vmatprep.subr.bf16.mxu0 %v2464_v47  ;;  %v2474_v56 = vld [vmem:[#allocation4 + $0x20] ss:$8 sps:$4 sm:$0xff]   ;;  %v2479_v57 = vld [vmem:[#allocation4 + $0x14] ss:$8 sps:$4 sm:$0xff]   ;;  %v2477_v58 = vld [vmem:[#allocation4 + $0x10] ss:$8 sps:$4 sm:$0xff]  }
  0x4a   : > { %969 = vmatprep.subr.bf16.mxu1 %v2426_v18  ;;  %v2482_v60 = vld [vmem:[#allocation4 + $0x4] ss:$8 sps:$4 sm:$0xff]   ;;  %v2480_v61 = vld [vmem:[#allocation4] ss:$8 sps:$4 sm:$0xff]   ;;  %v2485_v63 = vld [vmem:[#allocation4 + $0xf4] ss:$8 sps:$4 sm:$0xff]  }
  0x4b   : > { %v401_v2 = vld [vmem:[%s3251_s2] sm:$0x3] }
  0x4c   : > { %1423 = vmatpush1.bf16.msra.mxu0 %v2462_v48  ;;  %v3083_v4 = vrot.slane %v401_v2, %v3075_v1  ;;  %v3086_v5 = vrot.slane %v401_v2, %v3080_v3 }
  0x4d   : > { %970 = vmatpush1.bf16.msra.mxu1 %v2428_v20  ;;  %1424 = vmatprep.subr.bf16.mxu0 %v2467_v49 }
  0x4e   : > { %2105 = vmatmul.mubr.msk.bf16.gmra.mxu0 %vm473_vm0, %v2405_v14  ;;  %971 = vmatprep.subr.bf16.mxu1 %v2429_v21 }
  0x4f   : > { %560 = vmatprep.mubr.bf16.mxu0 %v2816_v0 }
  0x50   : > { %1425 = vmatpush1.bf16.msra.mxu0 %v2465_v50 }
  0x51   : > { %972 = vmatpush1.bf16.msra.mxu1 %v2431_v22  ;;  %1426 = vmatprep.subr.bf16.mxu0 %v2470_v51 }
  0x52   : > { %973 = vmatprep.subr.bf16.mxu1 %v2432_v23 }
  0x54   : > { %1427 = vmatpush1.bf16.msra.mxu0 %v2468_v52 }
  0x55   : > { %974 = vmatpush1.bf16.msra.mxu1 %v2434_v25  ;;  %1428 = vmatprep.subr.bf16.mxu0 %v2473_v53 }
  0x56   : > { %2106 = vmatmul.mubr.msk.bf16.gmra.mxu0 %vm473_vm0, %v2406_v19  ;;  %975 = vmatprep.subr.bf16.mxu1 %v2435_v29 }
  0x57   : > { %570 = vmatprep.mubr.bf16.mxu0 %v2816_v0 }
  0x58   : > { %1429 = vmatpush1.bf16.msra.mxu0 %v2471_v54 }
  0x59   : > { %976 = vmatpush2.bf16.msra.mxu1 %v2437_v30  ;;  %1430 = vmatprep.subr.bf16.mxu0 %v2476_v55 }
  0x5a   : > { %977 = vmatprep.subr.bf16.mxu1 %v2438_v31 }
  0x5c   : > { %1431 = vmatpush1.bf16.msra.mxu0 %v2474_v56 }
  0x5d   : > { %978 = vmatpush2.bf16.msra.mxu1 %v2440_v32  ;;  %1432 = vmatprep.subr.bf16.mxu0 %v2479_v57 }
  0x5e   : > { %2107 = vmatmul.mubr.msk.bf16.gmra.mxu0 %vm473_vm0, %v2407_v24  ;;  %979 = vmatprep.subr.bf16.mxu1 %v2441_v33 }
  0x5f   : > { %580 = vmatprep.mubr.bf16.mxu0 %v2816_v0 }
  0x60   : > { %1433 = vmatpush1.bf16.msra.mxu0 %v2477_v58 }
  0x61   : > { %980 = vmatpush2.bf16.msra.mxu1 %v2443_v34  ;;  %1434 = vmatprep.subr.bf16.mxu0 %v2482_v60 }
  0x62   : > { %981 = vmatprep.subr.bf16.mxu1 %v2444_v35 }
  0x64   : > { %1435 = vmatpush1.bf16.msra.mxu0 %v2480_v61 }
  0x65   : > { %982 = vmatpush2.bf16.msra.mxu1 %v2446_v36  ;;  %1436 = vmatprep.subr.bf16.mxu0 %v2485_v63 }
  0x66   : > { %2108 = vmatmul.mubr.msk.bf16.gmra.mxu0 %vm473_vm0, %v2408_v26  ;;  %983 = vmatprep.subr.bf16.mxu1 %v2447_v37 }
  0x67   : > { %590 = vmatprep.mubr.bf16.mxu0 %v2816_v0 }
  0x69   : > { %984 = vmatpush2.bf16.msra.mxu1 %v2449_v38 }
  0x6a   : > { %985 = vmatprep.subr.bf16.mxu1 %v2450_v39 }
  0x6d   : > { %986 = vmatpush2.bf16.msra.mxu1 %v2452_v40 }
  0x6e   : > { %2109 = vmatmul.mubr.msk.bf16.gmra.mxu0 %vm473_vm0, %v2409_v27  ;;  %987 = vmatprep.subr.bf16.mxu1 %v2453_v41 }
  0x6f   : > { %600 = vmatprep.mubr.bf16.mxu0 %v2816_v0  ;;  %v2483_v0 = vld [vmem:[#allocation4 + $0xf0] ss:$8 sps:$4 sm:$0xff]  }
  0x70   : > { %1437 = vmatpush2.bf16.msra.mxu0 %v2483_v0 }
  0x71   : > { %988 = vmatpush2.bf16.msra.mxu1 %v2455_v42 }
  0x72   : > { %989 = vmatprep.subr.bf16.mxu1 %v2456_v43 }
  0x75   : > { %990 = vmatpush2.bf16.msra.mxu1 %v2458_v44 }
  0x76   : > { %2110 = vmatmul.mubr.msk.bf16.gmra.mxu0 %vm473_vm0, %v2410_v28 }
  0xfe   : > { %v532_v6 = vpop.f32.mrf.mxu0 }
  0xff   : > { %v533_v7 = vadd.f32 %v532_v6, %v3083_v4 }
 0x100   : > { %v534_v8 = vpop.f32.mrf.mxu0 }
 0x101   : > { %v611_v9 = vmul.f32 0.5, %v533_v7  ;;  %v535_v10 = vadd.f32 %v534_v8, %v3086_v5 }
 0x102   : > { %v536_v11 = vpop.f32.mrf.mxu0 }
 0x103   : > { %v612_v12 = vmul.f32 0.5, %v535_v10  ;;  %v537_v13 = vadd.f32 %v536_v11, %v3083_v4  ;;  %2523 = vtanh.f32 %v611_v9 }
 0x104   : > { %v538_v14 = vpop.f32.mrf.mxu0 }
 0x105   : > { %v613_v15 = vmul.f32 0.5, %v537_v13  ;;  %v539_v16 = vadd.f32 %v538_v14, %v3086_v5  ;;  %2525 = vtanh.f32 %v612_v12 }
 0x106   : > { %v542_v17 = vpop.f32.mrf.mxu0 }
 0x107   : > { %2527 = vtanh.f32 %v613_v15  ;;  %v614_v18 = vmul.f32 0.5, %v539_v16  ;;  %v543_v19 = vadd.f32 %v542_v17, %v3083_v4 }
 0x108   : > { %v544_v20 = vpop.f32.mrf.mxu0 }
 0x109   : > { %2529 = vtanh.f32 %v614_v18  ;;  %v615_v21 = vmul.f32 0.5, %v543_v19  ;;  %v545_v22 = vadd.f32 %v544_v20, %v3086_v5 }
 0x10a   : > { %v546_v23 = vpop.f32.mrf.mxu0 }
 0x10b   : > { %v616_v24 = vmul.f32 0.5, %v545_v22  ;;  %v547_v25 = vadd.f32 %v546_v23, %v3083_v4  ;;  %2531 = vtanh.f32 %v615_v21 }
 0x10c   : > { %v548_v26 = vpop.f32.mrf.mxu0 }
 0x10d   : > { %v617_v27 = vmul.f32 0.5, %v547_v25  ;;  %v549_v28 = vadd.f32 %v548_v26, %v3086_v5  ;;  %2533 = vtanh.f32 %v616_v24 }
 0x10e   : > { %v552_v29 = vpop.f32.mrf.mxu0 }
 0x10f   : > { %2535 = vtanh.f32 %v617_v27  ;;  %v618_v30 = vmul.f32 0.5, %v549_v28  ;;  %v553_v31 = vadd.f32 %v552_v29, %v3083_v4 }
 0x110   : > { %v554_v32 = vpop.f32.mrf.mxu0  ;;  %v2524_v35 = vpop.eup %2523 }
 0x111   : > { %2537 = vtanh.f32 %v618_v30  ;;  %v619_v33 = vmul.f32 0.5, %v553_v31  ;;  %v555_v34 = vadd.f32 %v554_v32, %v3086_v5  ;;  %v675_v48 = vmul.f32 0.5, %v2524_v35 }
 0x112   : > { %v556_v36 = vpop.f32.mrf.mxu0  ;;  %v2526_v37 = vpop.eup %2525 }
 0x113   : > { %v620_v38 = vmul.f32 0.5, %v555_v34  ;;  %v557_v39 = vadd.f32 %v556_v36, %v3083_v4  ;;  %2539 = vtanh.f32 %v619_v33  ;;  %v676_v47 = vmul.f32 0.5, %v2526_v37 }
 0x114   : > { %v2528_v40 = vpop.eup %2527  ;;  %v558_v41 = vpop.f32.mrf.mxu0  ;;  %v707_v61 = vadd.f32 0.5, %v675_v48 }
 0x115   : > { %v677_v42 = vmul.f32 0.5, %v2528_v40  ;;  %v621_v43 = vmul.f32 0.5, %v557_v39  ;;  %v559_v44 = vadd.f32 %v558_v41, %v3086_v5  ;;  %2541 = vtanh.f32 %v620_v38 }
 0x116   : > { %v2530_v45 = vpop.eup %2529  ;;  %v562_v46 = vpop.f32.mrf.mxu0  ;;  %v708_v58 = vadd.f32 0.5, %v676_v47 }
 0x117   : > { %2543 = vtanh.f32 %v621_v43  ;;  %v622_v49 = vmul.f32 0.5, %v559_v44  ;;  %v563_v50 = vadd.f32 %v562_v46, %v3083_v4  ;;  %v678_v52 = vmul.f32 0.5, %v2530_v45 }
 0x118   : > { %v564_v51 = vpop.f32.mrf.mxu0  ;;  %v709_v53 = vadd.f32 0.5, %v677_v42  ;;  %v2532_v55 = vpop.eup %2531 }
 0x119   : > { %2545 = vtanh.f32 %v622_v49  ;;  %v565_v54 = vadd.f32 %v564_v51, %v3086_v5  ;;  %v623_v56 = vmul.f32 0.5, %v563_v50  ;;  %v710_v59 = vadd.f32 0.5, %v678_v52 }
 0x11a   : > { %v566_v57 = vpop.f32.mrf.mxu0  ;;  %v2534_v60 = vpop.eup %2533  ;;  %v739_v9 = vpack.c.bf16 %v709_v53, %v707_v61  ;;  %v679_v11 = vmul.f32 0.5, %v2532_v55 }
 0x11b   : > { %v624_v62 = vmul.f32 0.5, %v565_v54  ;;  %v567_v0 = vadd.f32 %v566_v57, %v3083_v4  ;;  %v740_v6 = vpack.c.bf16 %v710_v59, %v708_v58  ;;  %v680_v12 = vmul.f32 0.5, %v2534_v60 }
 0x11c   : > { %v2536_v63 = vpop.eup %2535  ;;  %v568_v2 = vpop.f32.mrf.mxu0  ;;  %v711_v23 = vadd.f32 0.5, %v679_v11 }
 0x11d   : > { %v681_v7 = vmul.f32 0.5, %v2536_v63  ;;  %2547 = vtanh.f32 %v624_v62  ;;  %v569_v8 = vadd.f32 %v568_v2, %v3086_v5  ;;  %v625_v13 = vmul.f32 0.5, %v567_v0  ;;  %991 = vmatprep.mubr.bf16.mxu1 %v740_v6 }
 0x11e   : > { %v2538_v10 = vpop.eup %2537  ;;  %2549 = vtanh.f32 %v623_v56  ;;  %v572_v14 = vpop.f32.mrf.mxu0  ;;  %992 = vmatmul.mubr.bf16.vlgmr.msra.gmra.mxu1 %v739_v9  ;;  %v712_v24 = vadd.f32 0.5, %v680_v12 }
 0x11f   : > { %v682_v15 = vmul.f32 0.5, %v2538_v10  ;;  %v626_v16 = vmul.f32 0.5, %v569_v8  ;;  %v573_v17 = vadd.f32 %v572_v14, %v3083_v4  ;;  %v713_v18 = vadd.f32 0.5, %v681_v7 }
 0x120   : > { %2551 = vtanh.f32 %v625_v13  ;;  %v574_v19 = vpop.f32.mrf.mxu0  ;;  %v2540_v22 = vpop.eup %2539 }
 0x121   : > { %v714_v20 = vadd.f32 0.5, %v682_v15  ;;  %2553 = vtanh.f32 %v626_v16  ;;  %v627_v21 = vmul.f32 0.5, %v573_v17  ;;  %v575_v25 = vadd.f32 %v574_v19, %v3086_v5 }
 0x122   : > { %v576_v26 = vpop.f32.mrf.mxu0  ;;  %v2542_v27 = vpop.eup %2541  ;;  %v741_v33 = vpack.c.bf16 %v713_v18, %v711_v23  ;;  %v683_v38 = vmul.f32 0.5, %v2540_v22 }
 0x123   : > { %v577_v28 = vadd.f32 %v576_v26, %v3083_v4  ;;  %v628_v30 = vmul.f32 0.5, %v575_v25  ;;  %v742_v32 = vpack.c.bf16 %v714_v20, %v712_v24  ;;  %2555 = vtanh.f32 %v627_v21 }
 0x124   : > { %v2544_v29 = vpop.eup %2543  ;;  %v578_v31 = vpop.f32.mrf.mxu0  ;;  %v684_v39 = vmul.f32 0.5, %v2542_v27  ;;  %v715_v49 = vadd.f32 0.5, %v683_v38 }
 0x125   : > { %v685_v34 = vmul.f32 0.5, %v2544_v29  ;;  %v629_v35 = vmul.f32 0.5, %v577_v28  ;;  %v579_v36 = vadd.f32 %v578_v31, %v3086_v5  ;;  %2557 = vtanh.f32 %v628_v30  ;;  %1001 = vmatprep.mubr.bf16.mxu1 %v742_v32 }
 0x126   : > { %v2546_v37 = vpop.eup %2545  ;;  %v582_v40 = vpop.f32.mrf.mxu0  ;;  %1002 = vmatmul.mubr.bf16.gmra.mxu1 %v741_v33  ;;  %v716_v50 = vadd.f32 0.5, %v684_v39 }
 0x127   : > { %v686_v41 = vmul.f32 0.5, %v2546_v37  ;;  %2559 = vtanh.f32 %v629_v35  ;;  %v630_v42 = vmul.f32 0.5, %v579_v36  ;;  %v717_v43 = vadd.f32 0.5, %v685_v34 }
 0x128   : > { %v583_v44 = vadd.f32 %v582_v40, %v3083_v4  ;;  %v584_v45 = vpop.f32.mrf.mxu0 }
 0x129   : > { %v718_v46 = vadd.f32 0.5, %v686_v41  ;;  %2561 = vtanh.f32 %v630_v42  ;;  %v585_v47 = vadd.f32 %v584_v45, %v3086_v5  ;;  %v743_v58 = vpack.c.bf16 %v717_v43, %v715_v49 }
 0x12a   : > { %v2548_v48 = vpop.eup %2547  ;;  %v631_v51 = vmul.f32 0.5, %v583_v44  ;;  %v586_v52 = vpop.f32.mrf.mxu0 }
 0x12b   : > { %v2550_v53 = vpop.eup %2549  ;;  %v632_v54 = vmul.f32 0.5, %v585_v47  ;;  %v587_v55 = vadd.f32 %v586_v52, %v3083_v4  ;;  %v744_v57 = vpack.c.bf16 %v718_v46, %v716_v50  ;;  %v688_v60 = vmul.f32 0.5, %v2548_v48 }
 0x12c   : > { %v588_v56 = vpop.f32.mrf.mxu0  ;;  %v687_v0 = vmul.f32 0.5, %v2550_v53 }
 0x12d   : > { %v2552_v59 = vpop.eup %2551  ;;  %2563 = vtanh.f32 %v632_v54  ;;  %v633_v61 = vmul.f32 0.5, %v587_v55  ;;  %v589_v62 = vadd.f32 %v588_v56, %v3086_v5  ;;  %1011 = vmatprep.mubr.bf16.mxu1 %v744_v57  ;;  %v720_v12 = vadd.f32 0.5, %v688_v60 }
 0x12e   : > { %v2554_v63 = vpop.eup %2553  ;;  %v689_v2 = vmul.f32 0.5, %v2552_v59  ;;  %2565 = vtanh.f32 %v631_v51  ;;  %v592_v6 = vpop.f32.mrf.mxu0  ;;  %1012 = vmatmul.mubr.bf16.gmra.mxu1 %v743_v58  ;;  %v719_v16 = vadd.f32 0.5, %v687_v0 }
 0x12f   : > { %v690_v7 = vmul.f32 0.5, %v2554_v63  ;;  %2567 = vtanh.f32 %v633_v61  ;;  %v634_v8 = vmul.f32 0.5, %v589_v62  ;;  %v593_v9 = vadd.f32 %v592_v6, %v3083_v4 }
 0x130   : > { %v721_v10 = vadd.f32 0.5, %v689_v2  ;;  %v594_v11 = vpop.f32.mrf.mxu0  ;;  %v2556_v15 = vpop.eup %2555 }
 0x131   : > { %v722_v13 = vadd.f32 0.5, %v690_v7  ;;  %2569 = vtanh.f32 %v634_v8  ;;  %v635_v14 = vmul.f32 0.5, %v593_v9  ;;  %v595_v17 = vadd.f32 %v594_v11, %v3086_v5 }
 0x132   : > { %v596_v18 = vpop.f32.mrf.mxu0  ;;  %v2558_v19 = vpop.eup %2557  ;;  %v745_v25 = vpack.c.bf16 %v721_v10, %v719_v16  ;;  %v691_v31 = vmul.f32 0.5, %v2556_v15 }
 0x133   : > { %v597_v20 = vadd.f32 %v596_v18, %v3083_v4  ;;  %v746_v21 = vpack.c.bf16 %v722_v13, %v720_v12  ;;  %2571 = vtanh.f32 %v635_v14  ;;  %v636_v23 = vmul.f32 0.5, %v595_v17 }
 0x134   : > { %v2560_v22 = vpop.eup %2559  ;;  %v598_v24 = vpop.f32.mrf.mxu0  ;;  %v692_v26 = vmul.f32 0.5, %v2558_v19  ;;  %v723_v42 = vadd.f32 0.5, %v691_v31 }
 0x135   : > { %v693_v27 = vmul.f32 0.5, %v2560_v22  ;;  %v637_v28 = vmul.f32 0.5, %v597_v20  ;;  %v599_v29 = vadd.f32 %v598_v24, %v3086_v5  ;;  %1021 = vmatprep.mubr.bf16.mxu1 %v746_v21  ;;  %2573 = vtanh.f32 %v636_v23 }
 0x136   : > { %v2562_v30 = vpop.eup %2561  ;;  %v602_v32 = vpop.f32.mrf.mxu0  ;;  %1022 = vmatmul.mubr.bf16.gmra.mxu1 %v745_v25  ;;  %v724_v38 = vadd.f32 0.5, %v692_v26 }
 0x137   : > { %v694_v33 = vmul.f32 0.5, %v2562_v30  ;;  %2575 = vtanh.f32 %v637_v28  ;;  %v638_v34 = vmul.f32 0.5, %v599_v29  ;;  %v725_v35 = vadd.f32 0.5, %v693_v27 }
 0x138   : > { %v603_v36 = vadd.f32 %v602_v32, %v3083_v4  ;;  %v604_v37 = vpop.f32.mrf.mxu0  ;;  %v2488_v32 = vld [vmem:[#allocation4 + $0xe4] ss:$8 sps:$4 sm:$0xff]  }
 0x139   : > { %v726_v39 = vadd.f32 0.5, %v694_v33  ;;  %2577 = vtanh.f32 %v638_v34  ;;  %v605_v40 = vadd.f32 %v604_v37, %v3086_v5  ;;  %v747_v51 = vpack.c.bf16 %v725_v35, %v723_v42  ;;  %v2486_v33 = vld [vmem:[#allocation4 + $0xe0] ss:$8 sps:$4 sm:$0xff]   ;;  %1438 = vmatprep.subr.bf16.mxu0 %v2488_v32  ;;  %v2491_v34 = vld [vmem:[#allocation4 + $0xd4] ss:$8 sps:$4 sm:$0xff]  }
 0x13a   : > { %v2564_v41 = vpop.eup %2563  ;;  %v639_v43 = vmul.f32 0.5, %v603_v36  ;;  %v606_v44 = vpop.f32.mrf.mxu0  ;;  %1439 = vmatpush2.bf16.msra.mxu0 %v2486_v33  ;;  %v2489_v35 = vld [vmem:[#allocation4 + $0xd0] ss:$8 sps:$4 sm:$0xff]   ;;  %v2494_v36 = vld [vmem:[#allocation4 + $0xc4] ss:$8 sps:$4 sm:$0xff]  }
 0x13b   : > { %v2566_v45 = vpop.eup %2565  ;;  %v640_v46 = vmul.f32 0.5, %v605_v40  ;;  %v607_v47 = vadd.f32 %v606_v44, %v3083_v4  ;;  %v748_v48 = vpack.c.bf16 %v726_v39, %v724_v38  ;;  %v696_v52 = vmul.f32 0.5, %v2564_v41  ;;  %1440 = vmatprep.subr.bf16.mxu0 %v2491_v34  ;;  %v2492_v37 = vld [vmem:[#allocation4 + $0xc0] ss:$8 sps:$4 sm:$0xff]   ;;  %v2497_v38 = vld [vmem:[#allocation4 + $0xb4] ss:$8 sps:$4 sm:$0xff]  }
 0x13c   : > { %v2568_v49 = vpop.eup %2567  ;;  %v608_v50 = vpop.f32.mrf.mxu0  ;;  %2579 = vtanh.f32 %v639_v43  ;;  %v695_v57 = vmul.f32 0.5, %v2566_v45  ;;  %v2495_v39 = vld [vmem:[#allocation4 + $0xb0] ss:$8 sps:$4 sm:$0xff]   ;;  %v2500_v40 = vld [vmem:[#allocation4 + $0xa4] ss:$8 sps:$4 sm:$0xff]  }
 0x13d   : > { %v697_v53 = vmul.f32 0.5, %v2568_v49  ;;  %v641_v54 = vmul.f32 0.5, %v607_v47  ;;  %1031 = vmatprep.mubr.bf16.mxu1 %v748_v48  ;;  %2581 = vtanh.f32 %v640_v46  ;;  %v609_v56 = vadd.f32 %v608_v50, %v3086_v5  ;;  %v2498_v41 = vld [vmem:[#allocation4 + $0xa0] ss:$8 sps:$4 sm:$0xff]   ;;  %v2503_v42 = vld [vmem:[#allocation4 + $0x94] ss:$8 sps:$4 sm:$0xff]  }
 0x13e   : > { %v2570_v55 = vpop.eup %2569  ;;  %1032 = vmatmul.mubr.bf16.gmra.mxu1 %v747_v51  ;;  %v728_v4 = vadd.f32 0.5, %v696_v52  ;;  %v727_v0 = vadd.f32 0.5, %v695_v57  ;;  %1441 = vmatpush2.bf16.msra.mxu0 %v2489_v35  ;;  %v2501_v43 = vld [vmem:[#allocation4 + $0x90] ss:$8 sps:$4 sm:$0xff]   ;;  %v2506_v44 = vld [vmem:[#allocation4 + $0x84] ss:$8 sps:$4 sm:$0xff]  }
 0x13f   : > { %v698_v58 = vmul.f32 0.5, %v2570_v55  ;;  %2583 = vtanh.f32 %v641_v54  ;;  %v642_v59 = vmul.f32 0.5, %v609_v56  ;;  %v729_v61 = vadd.f32 0.5, %v697_v53  ;;  %1442 = vmatprep.subr.bf16.mxu0 %v2494_v36  ;;  %v2504_v45 = vld [vmem:[#allocation4 + $0x80] ss:$8 sps:$4 sm:$0xff]   ;;  %v2507_v46 = vld [vmem:[#allocation6 + $0x78] sm:$0xff]  }
 0x140   : > { %v2572_v60 = vpop.eup %2571  ;;  %v3120_v47 = vld [vmem:[#allocation6 + $0x38] sm:$0xff]   ;;  %2337 = vmatprep.subr.bf16.mxu1 %v2507_v46  ;;  %v3122_v48 = vld [vmem:[#allocation6 + $0x70] sm:$0xff]   ;;  %v787_v49 = vld [vmem:[%s3253_s4] sm:$0x3] }
 0x141   : > { %v730_v62 = vadd.f32 0.5, %v698_v58  ;;  %2585 = vtanh.f32 %v642_v59  ;;  %v749_v9 = vpack.c.bf16 %v729_v61, %v727_v0  ;;  %v699_v5 = vmul.f32 0.5, %v2572_v60  ;;  %2345 = vmatpush3.bf16.msra.mxu1 %v3120_v47 }
 0x142   : > { %v2574_v63 = vpop.eup %2573  ;;  %1443 = vmatpush2.bf16.msra.mxu0 %v2492_v37  ;;  %2338 = vmatprep.subr.bf16.mxu1 %v3122_v48  ;;  %v3130_v50 = vrot.slane %v787_v49, %v3075_v1  ;;  %v3133_v51 = vrot.slane %v787_v49, %v3080_v3 }
 0x143   : > { %v750_v2 = vpack.c.bf16 %v730_v62, %v728_v4  ;;  %v700_v7 = vmul.f32 0.5, %v2574_v63  ;;  %v731_v17 = vadd.f32 0.5, %v699_v5  ;;  %1444 = vmatprep.subr.bf16.mxu0 %v2497_v38 }
 0x144   : > { %v2576_v6 = vpop.eup %2575 }
 0x145   : > { %v701_v8 = vmul.f32 0.5, %v2576_v6  ;;  %1041 = vmatprep.mubr.bf16.mxu1 %v750_v2  ;;  %v732_v12 = vadd.f32 0.5, %v700_v7 }
 0x146   : > { %v2578_v10 = vpop.eup %2577  ;;  %1042 = vmatmul.mubr.bf16.gmra.mxu1 %v749_v9  ;;  %1445 = vmatpush2.bf16.msra.mxu0 %v2495_v39 }
 0x147   : > { %v702_v11 = vmul.f32 0.5, %v2578_v10  ;;  %v733_v13 = vadd.f32 0.5, %v701_v8  ;;  %1446 = vmatprep.subr.bf16.mxu0 %v2500_v40 }
 0x149   : > { %v734_v14 = vadd.f32 0.5, %v702_v11  ;;  %v2580_v15 = vpop.eup %2579  ;;  %v751_v21 = vpack.c.bf16 %v733_v13, %v731_v17 }
 0x14a   : > { %v2582_v16 = vpop.eup %2581  ;;  %v703_v24 = vmul.f32 0.5, %v2580_v15  ;;  %1447 = vmatpush2.bf16.msra.mxu0 %v2498_v41 }
 0x14b   : > { %v752_v18 = vpack.c.bf16 %v734_v14, %v732_v12  ;;  %v704_v22 = vmul.f32 0.5, %v2582_v16  ;;  %1448 = vmatprep.subr.bf16.mxu0 %v2503_v42 }
 0x14c   : > { %v2584_v19 = vpop.eup %2583  ;;  %v735_v29 = vadd.f32 0.5, %v703_v24 }
 0x14d   : > { %v705_v20 = vmul.f32 0.5, %v2584_v19  ;;  %1051 = vmatprep.mubr.bf16.mxu1 %v752_v18  ;;  %v736_v27 = vadd.f32 0.5, %v704_v22 }
 0x14e   : > { %v2586_v23 = vpop.eup %2585  ;;  %1052 = vmatmul.mubr.bf16.gmra.mxu1 %v751_v21  ;;  %1449 = vmatpush2.bf16.msra.mxu0 %v2501_v43 }
 0x14f   : > { %v706_v25 = vmul.f32 0.5, %v2586_v23  ;;  %v737_v26 = vadd.f32 0.5, %v705_v20  ;;  %1450 = vmatprep.subr.bf16.mxu0 %v2506_v44 }
 0x151   : > { %v738_v28 = vadd.f32 0.5, %v706_v25  ;;  %v753_v31 = vpack.c.bf16 %v737_v26, %v735_v29 }
 0x152   : > { %1451 = vmatpush2.bf16.msra.mxu0 %v2504_v45 }
 0x153   : > { %v754_v30 = vpack.c.bf16 %v738_v28, %v736_v27  ;;  %2273 = vmatprep.subr.bf16.mxu0 %v2507_v46 }
 0x155   : > { %1061 = vmatprep.mubr.bf16.mxu1 %v754_v30 }
 0x156   : > { %1062 = vmatmul.mubr.bf16.gmra.mxu1 %v753_v31 }
 0x1de   : > { %v993_v52 = vpop.f32.mrf.mxu1 }
 0x1df   : > { %v994_v53 = vadd.f32 %v993_v52, %v3130_v50 }
 0x1e0   : > { %v995_v54 = vpop.f32.mrf.mxu1 }
 0x1e1   : > { %v996_v55 = vadd.f32 %v995_v54, %v3133_v51  ;;  %v1072_v56 = vmul.f32 0.5, %v994_v53 }
 0x1e2   : > { %v997_v57 = vpop.f32.mrf.mxu1 }
 0x1e3   : > { %v1073_v58 = vmul.f32 0.5, %v996_v55  ;;  %v998_v59 = vadd.f32 %v997_v57, %v3130_v50 }
 0x1e4   : > { %v999_v60 = vpop.f32.mrf.mxu1 }
 0x1e5   : > { %2587 = vtanh.f32 %v1073_v58  ;;  %v1074_v4 = vmul.f32 0.5, %v998_v59  ;;  %v1000_v61 = vadd.f32 %v999_v60, %v3133_v51 }
 0x1e6   : > { %2589 = vtanh.f32 %v1072_v56  ;;  %v1003_v62 = vpop.f32.mrf.mxu1 }
 0x1e7   : > { %2591 = vtanh.f32 %v1074_v4  ;;  %v1075_v63 = vmul.f32 0.5, %v1000_v61  ;;  %v1004_v0 = vadd.f32 %v1003_v62, %v3130_v50 }
 0x1e8   : > { %v1005_v2 = vpop.f32.mrf.mxu1 }
 0x1e9   : > { %2593 = vtanh.f32 %v1075_v63  ;;  %v1076_v6 = vmul.f32 0.5, %v1004_v0  ;;  %v1006_v7 = vadd.f32 %v1005_v2, %v3133_v51 }
 0x1ea   : > { %v1007_v8 = vpop.f32.mrf.mxu1 }
 0x1eb   : > { %v1077_v9 = vmul.f32 0.5, %v1006_v7  ;;  %v1008_v10 = vadd.f32 %v1007_v8, %v3130_v50  ;;  %2595 = vtanh.f32 %v1076_v6 }
 0x1ec   : > { %v1009_v5 = vpop.f32.mrf.mxu1 }
 0x1ed   : > { %v1078_v11 = vmul.f32 0.5, %v1008_v10  ;;  %v1010_v12 = vadd.f32 %v1009_v5, %v3133_v51  ;;  %2597 = vtanh.f32 %v1077_v9 }
 0x1ee   : > { %v1013_v13 = vpop.f32.mrf.mxu1 }
 0x1ef   : > { %2599 = vtanh.f32 %v1078_v11  ;;  %v1079_v14 = vmul.f32 0.5, %v1010_v12  ;;  %v1014_v15 = vadd.f32 %v1013_v13, %v3130_v50 }
 0x1f0   : > { %v1015_v16 = vpop.f32.mrf.mxu1 }
 0x1f1   : > { %2601 = vtanh.f32 %v1079_v14  ;;  %v1016_v17 = vadd.f32 %v1015_v16, %v3133_v51  ;;  %v1080_v19 = vmul.f32 0.5, %v1014_v15 }
 0x1f2   : > { %v2588_v18 = vpop.eup %2587  ;;  %v1017_v20 = vpop.f32.mrf.mxu1 }
 0x1f3   : > { %v2590_v21 = vpop.eup %2589  ;;  %v1081_v22 = vmul.f32 0.5, %v1016_v17  ;;  %v1018_v24 = vadd.f32 %v1017_v20, %v3130_v50  ;;  %v1137_v26 = vmul.f32 0.5, %v2588_v18 }
 0x1f4   : > { %v2592_v23 = vpop.eup %2591  ;;  %v1019_v25 = vpop.f32.mrf.mxu1  ;;  %v1136_v30 = vmul.f32 0.5, %v2590_v21 }
 0x1f5   : > { %v1138_v27 = vmul.f32 0.5, %v2592_v23  ;;  %2603 = vtanh.f32 %v1081_v22  ;;  %v1020_v28 = vadd.f32 %v1019_v25, %v3133_v51  ;;  %v1082_v31 = vmul.f32 0.5, %v1018_v24 }
 0x1f6   : > { %v2594_v29 = vpop.eup %2593  ;;  %2605 = vtanh.f32 %v1080_v19  ;;  %v1023_v32 = vpop.f32.mrf.mxu1  ;;  %v1169_v38 = vadd.f32 0.5, %v1137_v26  ;;  %v1168_v41 = vadd.f32 0.5, %v1136_v30 }
 0x1f7   : > { %v1139_v33 = vmul.f32 0.5, %v2594_v29  ;;  %v1083_v34 = vmul.f32 0.5, %v1020_v28  ;;  %v1024_v35 = vadd.f32 %v1023_v32, %v3130_v50  ;;  %v1170_v36 = vadd.f32 0.5, %v1138_v27 }
 0x1f8   : > { %2607 = vtanh.f32 %v1082_v31  ;;  %v1025_v37 = vpop.f32.mrf.mxu1  ;;  %v2596_v40 = vpop.eup %2595 }
 0x1f9   : > { %v1171_v39 = vadd.f32 0.5, %v1139_v33  ;;  %2609 = vtanh.f32 %v1083_v34  ;;  %v1084_v42 = vmul.f32 0.5, %v1024_v35  ;;  %v1026_v43 = vadd.f32 %v1025_v37, %v3133_v51 }
 0x1fa   : > { %v1027_v44 = vpop.f32.mrf.mxu1  ;;  %v2598_v45 = vpop.eup %2597  ;;  %v1200_v53 = vpack.c.bf16 %v1170_v36, %v1168_v41  ;;  %v1140_v60 = vmul.f32 0.5, %v2596_v40 }
 0x1fb   : > { %v1028_v46 = vadd.f32 %v1027_v44, %v3130_v50  ;;  %v1201_v49 = vpack.c.bf16 %v1171_v39, %v1169_v38  ;;  %v1085_v54 = vmul.f32 0.5, %v1026_v43  ;;  %2611 = vtanh.f32 %v1084_v42 }
 0x1fc   : > { %v2600_v52 = vpop.eup %2599  ;;  %v1029_v55 = vpop.f32.mrf.mxu1  ;;  %v1141_v4 = vmul.f32 0.5, %v2598_v45  ;;  %v1172_v10 = vadd.f32 0.5, %v1140_v60 }
 0x1fd   : > { %v1142_v56 = vmul.f32 0.5, %v2600_v52  ;;  %v1086_v57 = vmul.f32 0.5, %v1028_v46  ;;  %v1030_v58 = vadd.f32 %v1029_v55, %v3133_v51  ;;  %1452 = vmatprep.mubr.bf16.mxu0 %v1201_v49  ;;  %2613 = vtanh.f32 %v1085_v54 }
 0x1fe   : > { %v2602_v59 = vpop.eup %2601  ;;  %v1033_v61 = vpop.f32.mrf.mxu1  ;;  %1453 = vmatmul.mubr.bf16.vlgmr.msra.gmra.mxu0 %v1200_v53  ;;  %v1173_v5 = vadd.f32 0.5, %v1141_v4 }
 0x1ff   : > { %v1143_v62 = vmul.f32 0.5, %v2602_v59  ;;  %2615 = vtanh.f32 %v1086_v57  ;;  %v1087_v63 = vmul.f32 0.5, %v1030_v58  ;;  %2274 = vmatpush3.bf16.msra.mxu0 %v3120_v47  ;;  %v1174_v0 = vadd.f32 0.5, %v1142_v56 }
 0x200   : > { %v1034_v2 = vadd.f32 %v1033_v61, %v3130_v50  ;;  %v1035_v6 = vpop.f32.mrf.mxu1  ;;  %2275 = vmatprep.subr.bf16.mxu0 %v3122_v48 }
 0x201   : > { %v1175_v7 = vadd.f32 0.5, %v1143_v62  ;;  %2617 = vtanh.f32 %v1087_v63  ;;  %v1036_v8 = vadd.f32 %v1035_v6, %v3133_v51  ;;  %v1202_v17 = vpack.c.bf16 %v1174_v0, %v1172_v10 }
 0x202   : > { %v2604_v9 = vpop.eup %2603  ;;  %v1088_v11 = vmul.f32 0.5, %v1034_v2  ;;  %v1037_v12 = vpop.f32.mrf.mxu1 }
 0x203   : > { %v2606_v13 = vpop.eup %2605  ;;  %v1089_v14 = vmul.f32 0.5, %v1036_v8  ;;  %v1038_v15 = vadd.f32 %v1037_v12, %v3130_v50  ;;  %v1203_v16 = vpack.c.bf16 %v1175_v7, %v1173_v5  ;;  %v1145_v19 = vmul.f32 0.5, %v2604_v9 }
 0x204   : > { %v1039_v47 = vpop.f32.mrf.mxu1  ;;  %2619 = vtanh.f32 %v1088_v11  ;;  %v1144_v22 = vmul.f32 0.5, %v2606_v13 }
 0x205   : > { %v2608_v18 = vpop.eup %2607  ;;  %v1090_v48 = vmul.f32 0.5, %v1038_v15  ;;  %v1040_v20 = vadd.f32 %v1039_v47, %v3133_v51  ;;  %2621 = vtanh.f32 %v1089_v14  ;;  %1462 = vmatprep.mubr.bf16.mxu0 %v1203_v16  ;;  %v1177_v30 = vadd.f32 0.5, %v1145_v19 }
 0x206   : > { %v2610_v21 = vpop.eup %2609  ;;  %v1146_v23 = vmul.f32 0.5, %v2608_v18  ;;  %v1043_v24 = vpop.f32.mrf.mxu1  ;;  %1463 = vmatmul.mubr.bf16.gmra.mxu0 %v1202_v17  ;;  %v1176_v34 = vadd.f32 0.5, %v1144_v22 }
 0x207   : > { %v1147_v25 = vmul.f32 0.5, %v2610_v21  ;;  %2623 = vtanh.f32 %v1090_v48  ;;  %v1091_v26 = vmul.f32 0.5, %v1040_v20  ;;  %v1044_v27 = vadd.f32 %v1043_v24, %v3130_v50 }
 0x208   : > { %v1178_v28 = vadd.f32 0.5, %v1146_v23  ;;  %v1045_v29 = vpop.f32.mrf.mxu1  ;;  %v2612_v33 = vpop.eup %2611 }
 0x209   : > { %v1179_v31 = vadd.f32 0.5, %v1147_v25  ;;  %2625 = vtanh.f32 %v1091_v26  ;;  %v1046_v32 = vadd.f32 %v1045_v29, %v3133_v51  ;;  %v1092_v35 = vmul.f32 0.5, %v1044_v27 }
 0x20a   : > { %v1047_v36 = vpop.f32.mrf.mxu1  ;;  %v2614_v37 = vpop.eup %2613  ;;  %v1204_v44 = vpack.c.bf16 %v1178_v28, %v1176_v34  ;;  %v1148_v54 = vmul.f32 0.5, %v2612_v33 }
 0x20b   : > { %v1093_v38 = vmul.f32 0.5, %v1046_v32  ;;  %v1048_v39 = vadd.f32 %v1047_v36, %v3130_v50  ;;  %v1205_v40 = vpack.c.bf16 %v1179_v31, %v1177_v30  ;;  %v1149_v42 = vmul.f32 0.5, %v2614_v37 }
 0x20c   : > { %v2616_v41 = vpop.eup %2615  ;;  %v1049_v43 = vpop.f32.mrf.mxu1  ;;  %v1180_v6 = vadd.f32 0.5, %v1148_v54 }
 0x20d   : > { %v1150_v45 = vmul.f32 0.5, %v2616_v41  ;;  %2627 = vtanh.f32 %v1093_v38  ;;  %v1094_v46 = vmul.f32 0.5, %v1048_v39  ;;  %v1050_v49 = vadd.f32 %v1049_v43, %v3133_v51  ;;  %1472 = vmatprep.mubr.bf16.mxu0 %v1205_v40 }
 0x20e   : > { %v2618_v52 = vpop.eup %2617  ;;  %2629 = vtanh.f32 %v1092_v35  ;;  %v1053_v53 = vpop.f32.mrf.mxu1  ;;  %1473 = vmatmul.mubr.bf16.gmra.mxu0 %v1204_v44  ;;  %v1181_v57 = vadd.f32 0.5, %v1149_v42 }
 0x20f   : > { %v1151_v55 = vmul.f32 0.5, %v2618_v52  ;;  %2631 = vtanh.f32 %v1094_v46  ;;  %v1095_v56 = vmul.f32 0.5, %v1050_v49  ;;  %v1054_v58 = vadd.f32 %v1053_v53, %v3130_v50 }
 0x210   : > { %v1055_v59 = vpop.f32.mrf.mxu1  ;;  %v1182_v60 = vadd.f32 0.5, %v1150_v45 }
 0x211   : > { %v1183_v4 = vadd.f32 0.5, %v1151_v55  ;;  %2633 = vtanh.f32 %v1095_v56  ;;  %v1056_v61 = vadd.f32 %v1055_v59, %v3133_v51  ;;  %v2620_v62 = vpop.eup %2619  ;;  %v1096_v63 = vmul.f32 0.5, %v1054_v58 }
 0x212   : > { %v1057_v0 = vpop.f32.mrf.mxu1  ;;  %v2622_v2 = vpop.eup %2621  ;;  %v1206_v13 = vpack.c.bf16 %v1182_v60, %v1180_v6  ;;  %v1152_v15 = vmul.f32 0.5, %v2620_v62 }
 0x213   : > { %v1097_v7 = vmul.f32 0.5, %v1056_v61  ;;  %v1058_v8 = vadd.f32 %v1057_v0, %v3130_v50  ;;  %v1207_v9 = vpack.c.bf16 %v1183_v4, %v1181_v57  ;;  %2635 = vtanh.f32 %v1096_v63 }
 0x214   : > { %v2624_v10 = vpop.eup %2623  ;;  %v1059_v5 = vpop.f32.mrf.mxu1  ;;  %v1153_v47 = vmul.f32 0.5, %v2622_v2  ;;  %v1184_v25 = vadd.f32 0.5, %v1152_v15 }
 0x215   : > { %v1154_v11 = vmul.f32 0.5, %v2624_v10  ;;  %v1098_v12 = vmul.f32 0.5, %v1058_v8  ;;  %1482 = vmatprep.mubr.bf16.mxu0 %v1207_v9  ;;  %2637 = vtanh.f32 %v1097_v7  ;;  %v1060_v16 = vadd.f32 %v1059_v5, %v3133_v51 }
 0x216   : > { %v2626_v14 = vpop.eup %2625  ;;  %v1063_v17 = vpop.f32.mrf.mxu1  ;;  %1483 = vmatmul.mubr.bf16.gmra.mxu0 %v1206_v13  ;;  %v1185_v26 = vadd.f32 0.5, %v1153_v47 }
 0x217   : > { %v1155_v18 = vmul.f32 0.5, %v2626_v14  ;;  %2639 = vtanh.f32 %v1098_v12  ;;  %v1064_v19 = vadd.f32 %v1063_v17, %v3130_v50  ;;  %v1186_v48 = vadd.f32 0.5, %v1154_v11  ;;  %v2510_v17 = vld [vmem:[#allocation6 + $0x30] sm:$0xff]  }
 0x218   : > { %v1099_v20 = vmul.f32 0.5, %v1060_v16  ;;  %v1065_v21 = vpop.f32.mrf.mxu1  ;;  %2346 = vmatpush3.bf16.msra.mxu1 %v2510_v17  ;;  %2276 = vmatpush3.bf16.msra.mxu0 %v2510_v17 }
 0x219   : > { %v1187_v22 = vadd.f32 0.5, %v1155_v18  ;;  %v1066_v23 = vadd.f32 %v1065_v21, %v3133_v51  ;;  %v1100_v29 = vmul.f32 0.5, %v1064_v19  ;;  %v1208_v35 = vpack.c.bf16 %v1186_v48, %v1184_v25  ;;  %v2511_v18 = vld [vmem:[#allocation6 + $0x68] sm:$0xff]   ;;  %v2513_v48 = vld [vmem:[#allocation6 + $0x60] sm:$0xff]   ;;  %v2515_v21 = vld [vmem:[#allocation6 + $0x58] sm:$0xff]  }
 0x21a   : > { %v2628_v24 = vpop.eup %2627  ;;  %2641 = vtanh.f32 %v1099_v20  ;;  %v1067_v27 = vpop.f32.mrf.mxu1  ;;  %v2512_v19 = vld [vmem:[#allocation6 + $0x28] sm:$0xff]   ;;  %2339 = vmatprep.subr.bf16.mxu1 %v2511_v18  ;;  %2277 = vmatprep.subr.bf16.mxu0 %v2511_v18  ;;  %v2514_v20 = vld [vmem:[#allocation6 + $0x20] sm:$0xff]  }
 0x21b   : > { %v2630_v28 = vpop.eup %2629  ;;  %v1101_v30 = vmul.f32 0.5, %v1066_v23  ;;  %v1068_v32 = vadd.f32 %v1067_v27, %v3130_v50  ;;  %v1209_v34 = vpack.c.bf16 %v1187_v22, %v1185_v26  ;;  %v1157_v36 = vmul.f32 0.5, %v2628_v24  ;;  %v2516_v22 = vld [vmem:[#allocation6 + $0x18] sm:$0xff]   ;;  %v2517_v23 = vld [vmem:[#allocation6 + $0x50] sm:$0xff]   ;;  %v2519_v25 = vld [vmem:[#allocation6 + $0x48] sm:$0xff]  }
 0x21c   : > { %v2632_v31 = vpop.eup %2631  ;;  %v1069_v33 = vpop.f32.mrf.mxu1  ;;  %v1156_v41 = vmul.f32 0.5, %v2630_v28  ;;  %2347 = vmatpush3.bf16.msra.mxu1 %v2512_v19  ;;  %2278 = vmatpush3.bf16.msra.mxu0 %v2512_v19  ;;  %v2518_v24 = vld [vmem:[#allocation6 + $0x10] sm:$0xff]   ;;  %v2520_v26 = vld [vmem:[#allocation6 + $0x8] sm:$0xff]   ;;  %v2521_v27 = vld [vmem:[#allocation6 + $0x40] sm:$0xff]  }
 0x21d   : > { %v1158_v37 = vmul.f32 0.5, %v2632_v31  ;;  %2643 = vtanh.f32 %v1101_v30  ;;  %v1070_v38 = vadd.f32 %v1069_v33, %v3133_v51  ;;  %v1102_v40 = vmul.f32 0.5, %v1068_v32  ;;  %1492 = vmatprep.mubr.bf16.mxu0 %v1209_v34  ;;  %2279 = vmatprep.subr.bf16.mxu0 %v2513_v48  ;;  %v2522_v28 = vld [vmem:[#allocation6] sm:$0xff]  }
 0x21e   : > { %v2634_v39 = vpop.eup %2633  ;;  %2645 = vtanh.f32 %v1100_v29  ;;  %1493 = vmatmul.mubr.bf16.gmra.mxu0 %v1208_v35  ;;  %v1189_v44 = vadd.f32 0.5, %v1157_v36  ;;  %v1188_v52 = vadd.f32 0.5, %v1156_v41  ;;  %2340 = vmatprep.subr.bf16.mxu1 %v2513_v48  ;;  %v1248_v29 = vld [vmem:[%s3255_s6] sm:$0x3] }
 0x21f   : > { %v1159_v42 = vmul.f32 0.5, %v2634_v39  ;;  %v1103_v43 = vmul.f32 0.5, %v1070_v38  ;;  %2647 = vtanh.f32 %v1102_v40  ;;  %v1190_v45 = vadd.f32 0.5, %v1158_v37 }
 0x220   : > { %v2636_v46 = vpop.eup %2635  ;;  %2280 = vmatpush3.bf16.msra.mxu0 %v2514_v20  ;;  %2348 = vmatpush3.bf16.msra.mxu1 %v2514_v20  ;;  %v3173_v30 = vrot.slane %v1248_v29, %v3075_v1  ;;  %v3176_v31 = vrot.slane %v1248_v29, %v3080_v3 }
 0x221   : > { %v1191_v50 = vadd.f32 0.5, %v1159_v42  ;;  %2649 = vtanh.f32 %v1103_v43  ;;  %v1210_v51 = vpack.c.bf16 %v1190_v45, %v1188_v52  ;;  %v1160_v58 = vmul.f32 0.5, %v2636_v46  ;;  %2281 = vmatprep.subr.bf16.mxu0 %v2515_v21  ;;  %2341 = vmatprep.subr.bf16.mxu1 %v2515_v21 }
 0x222   : > { %v2638_v49 = vpop.eup %2637 }
 0x223   : > { %v1211_v53 = vpack.c.bf16 %v1191_v50, %v1189_v44  ;;  %v1161_v56 = vmul.f32 0.5, %v2638_v49  ;;  %v1192_v63 = vadd.f32 0.5, %v1160_v58 }
 0x224   : > { %v2640_v54 = vpop.eup %2639  ;;  %2282 = vmatpush3.bf16.msra.mxu0 %v2516_v22  ;;  %2349 = vmatpush3.bf16.msra.mxu1 %v2516_v22 }
 0x225   : > { %v1162_v55 = vmul.f32 0.5, %v2640_v54  ;;  %1502 = vmatprep.mubr.bf16.mxu0 %v1211_v53  ;;  %v1193_v61 = vadd.f32 0.5, %v1161_v56  ;;  %2283 = vmatprep.subr.bf16.mxu0 %v2517_v23 }
 0x226   : > { %1503 = vmatmul.mubr.bf16.gmra.mxu0 %v1210_v51  ;;  %2342 = vmatprep.subr.bf16.mxu1 %v2517_v23 }
 0x227   : > { %v2642_v57 = vpop.eup %2641  ;;  %v1194_v60 = vadd.f32 0.5, %v1162_v55 }
 0x228   : > { %v1163_v59 = vmul.f32 0.5, %v2642_v57  ;;  %2284 = vmatpush3.bf16.msra.mxu0 %v2518_v24  ;;  %2350 = vmatpush3.bf16.msra.mxu1 %v2518_v24 }
 0x229   : > { %v1212_v8 = vpack.c.bf16 %v1194_v60, %v1192_v63  ;;  %2285 = vmatprep.subr.bf16.mxu0 %v2519_v25  ;;  %2343 = vmatprep.subr.bf16.mxu1 %v2519_v25 }
 0x22a   : > { %v2644_v4 = vpop.eup %2643  ;;  %v1195_v62 = vadd.f32 0.5, %v1163_v59 }
 0x22b   : > { %v2646_v0 = vpop.eup %2645  ;;  %v1165_v7 = vmul.f32 0.5, %v2644_v4 }
 0x22c   : > { %v1213_v2 = vpack.c.bf16 %v1195_v62, %v1193_v61  ;;  %v2648_v6 = vpop.eup %2647  ;;  %v1164_v5 = vmul.f32 0.5, %v2646_v0  ;;  %2286 = vmatpush3.bf16.msra.mxu0 %v2520_v26  ;;  %2351 = vmatpush3.bf16.msra.mxu1 %v2520_v26 }
 0x22d   : > { %v1166_v10 = vmul.f32 0.5, %v2648_v6  ;;  %v1197_v12 = vadd.f32 0.5, %v1165_v7  ;;  %2287 = vmatprep.subr.bf16.mxu0 %v2521_v27  ;;  %2344 = vmatprep.subr.bf16.mxu1 %v2521_v27 }
 0x22e   : > { %v2650_v9 = vpop.eup %2649  ;;  %1512 = vmatprep.mubr.bf16.mxu0 %v1213_v2  ;;  %v1196_v15 = vadd.f32 0.5, %v1164_v5 }
 0x22f   : > { %v1167_v11 = vmul.f32 0.5, %v2650_v9  ;;  %1513 = vmatmul.mubr.bf16.gmra.mxu0 %v1212_v8  ;;  %v1198_v13 = vadd.f32 0.5, %v1166_v10 }
 0x230   : > { %2288 = vmatpush3.bf16.msra.mxu0 %v2522_v28  ;;  %2352 = vmatpush3.bf16.msra.mxu1 %v2522_v28 }
 0x231   : > { %v1199_v14 = vadd.f32 0.5, %v1167_v11  ;;  %v1214_v16 = vpack.c.bf16 %v1198_v13, %v1196_v15 }
 0x233   : > { %v1215_v47 = vpack.c.bf16 %v1199_v14, %v1197_v12 }
 0x235   : > { %1522 = vmatprep.mubr.bf16.mxu0 %v1215_v47 }
 0x237   : > { %1523 = vmatmul.mubr.bf16.gmra.mxu0 %v1214_v16 }
 0x2be   : > { %v1454_v32 = vpop.f32.mrf.mxu0 }
 0x2bf   : > { %v1455_v33 = vadd.f32 %v1454_v32, %v3173_v30 }
 0x2c0   : > { %v1456_v34 = vpop.f32.mrf.mxu0 }
 0x2c1   : > { %v1457_v35 = vadd.f32 %v1456_v34, %v3176_v31  ;;  %v1533_v36 = vmul.f32 0.5, %v1455_v33 }
 0x2c2   : > { %v1458_v37 = vpop.f32.mrf.mxu0 }
 0x2c3   : > { %v1534_v38 = vmul.f32 0.5, %v1457_v35  ;;  %v1459_v39 = vadd.f32 %v1458_v37, %v3173_v30 }
 0x2c4   : > { %v1460_v40 = vpop.f32.mrf.mxu0 }
 0x2c5   : > { %2651 = vtanh.f32 %v1534_v38  ;;  %v1535_v41 = vmul.f32 0.5, %v1459_v39  ;;  %v1461_v1 = vadd.f32 %v1460_v40, %v3176_v31 }
 0x2c6   : > { %2653 = vtanh.f32 %v1533_v36  ;;  %v1464_v42 = vpop.f32.mrf.mxu0 }
 0x2c7   : > { %2655 = vtanh.f32 %v1535_v41  ;;  %v1536_v3 = vmul.f32 0.5, %v1461_v1  ;;  %v1465_v43 = vadd.f32 %v1464_v42, %v3173_v30 }
 0x2c8   : > { %v1466_v44 = vpop.f32.mrf.mxu0 }
 0x2c9   : > { %2657 = vtanh.f32 %v1536_v3  ;;  %v1537_v45 = vmul.f32 0.5, %v1465_v43  ;;  %v1467_v50 = vadd.f32 %v1466_v44, %v3176_v31 }
 0x2ca   : > { %v1468_v46 = vpop.f32.mrf.mxu0 }
 0x2cb   : > { %v1538_v49 = vmul.f32 0.5, %v1467_v50  ;;  %v1469_v52 = vadd.f32 %v1468_v46, %v3173_v30  ;;  %2659 = vtanh.f32 %v1537_v45 }
 0x2cc   : > { %v1470_v53 = vpop.f32.mrf.mxu0 }
 0x2cd   : > { %v1539_v54 = vmul.f32 0.5, %v1469_v52  ;;  %v1471_v55 = vadd.f32 %v1470_v53, %v3176_v31  ;;  %2661 = vtanh.f32 %v1538_v49 }
 0x2ce   : > { %v1474_v51 = vpop.f32.mrf.mxu0 }
 0x2cf   : > { %2663 = vtanh.f32 %v1539_v54  ;;  %v1540_v56 = vmul.f32 0.5, %v1471_v55  ;;  %v1475_v57 = vadd.f32 %v1474_v51, %v3173_v30 }
 0x2d0   : > { %v1476_v58 = vpop.f32.mrf.mxu0 }
 0x2d1   : > { %2665 = vtanh.f32 %v1540_v56  ;;  %v1541_v60 = vmul.f32 0.5, %v1475_v57  ;;  %v1477_v4 = vadd.f32 %v1476_v58, %v3176_v31 }
 0x2d2   : > { %v2652_v59 = vpop.eup %2651  ;;  %v1478_v62 = vpop.f32.mrf.mxu0 }
 0x2d3   : > { %v2654_v61 = vpop.eup %2653  ;;  %v1542_v0 = vmul.f32 0.5, %v1477_v4  ;;  %v1479_v2 = vadd.f32 %v1478_v62, %v3173_v30  ;;  %v1598_v6 = vmul.f32 0.5, %v2652_v59  ;;  %2667 = vtanh.f32 %v1541_v60 }
 0x2d4   : > { %v2656_v63 = vpop.eup %2655  ;;  %v1480_v8 = vpop.f32.mrf.mxu0  ;;  %v1597_v10 = vmul.f32 0.5, %v2654_v61 }
 0x2d5   : > { %v1599_v7 = vmul.f32 0.5, %v2656_v63  ;;  %v1543_v5 = vmul.f32 0.5, %v1479_v2  ;;  %v1481_v11 = vadd.f32 %v1480_v8, %v3176_v31  ;;  %2669 = vtanh.f32 %v1542_v0 }
 0x2d6   : > { %v2658_v9 = vpop.eup %2657  ;;  %v1484_v13 = vpop.f32.mrf.mxu0  ;;  %v1630_v16 = vadd.f32 0.5, %v1598_v6  ;;  %v1629_v19 = vadd.f32 0.5, %v1597_v10 }
 0x2d7   : > { %v1600_v12 = vmul.f32 0.5, %v2658_v9  ;;  %v1631_v14 = vadd.f32 0.5, %v1599_v7  ;;  %2671 = vtanh.f32 %v1543_v5  ;;  %v1544_v15 = vmul.f32 0.5, %v1481_v11 }
 0x2d8   : > { %v1485_v47 = vadd.f32 %v1484_v13, %v3173_v30  ;;  %v1486_v18 = vpop.f32.mrf.mxu0  ;;  %v2660_v20 = vpop.eup %2659 }
 0x2d9   : > { %v1632_v17 = vadd.f32 0.5, %v1600_v12  ;;  %2673 = vtanh.f32 %v1544_v15  ;;  %v1487_v48 = vadd.f32 %v1486_v18, %v3176_v31  ;;  %v1661_v25 = vpack.c.bf16 %v1631_v14, %v1629_v19 }
 0x2da   : > { %v1545_v21 = vmul.f32 0.5, %v1485_v47  ;;  %v1488_v22 = vpop.f32.mrf.mxu0  ;;  %v2662_v24 = vpop.eup %2661  ;;  %v1601_v35 = vmul.f32 0.5, %v2660_v20 }
 0x2db   : > { %v1662_v23 = vpack.c.bf16 %v1632_v17, %v1630_v16  ;;  %v1546_v26 = vmul.f32 0.5, %v1487_v48  ;;  %v1489_v28 = vadd.f32 %v1488_v22, %v3173_v30  ;;  %v1602_v36 = vmul.f32 0.5, %v2662_v24 }
 0x2dc   : > { %v2664_v27 = vpop.eup %2663  ;;  %v1490_v29 = vpop.f32.mrf.mxu0  ;;  %v1633_v45 = vadd.f32 0.5, %v1601_v35 }
 0x2dd   : > { %1844 = vmatprep.mubr.bf16.mxu0 %v1662_v23  ;;  %v1603_v32 = vmul.f32 0.5, %v2664_v27  ;;  %2675 = vtanh.f32 %v1546_v26  ;;  %v1491_v33 = vadd.f32 %v1490_v29, %v3176_v31  ;;  %v1547_v37 = vmul.f32 0.5, %v1489_v28 }
 0x2de   : > { %1845 = vmatmul.mubr.bf16.vlgmr.msra.gmra.mxu0 %v1661_v25  ;;  %v2666_v34 = vpop.eup %2665  ;;  %2677 = vtanh.f32 %v1545_v21  ;;  %v1494_v38 = vpop.f32.mrf.mxu0  ;;  %v1634_v50 = vadd.f32 0.5, %v1602_v36 }
 0x2df   : > { %v1604_v39 = vmul.f32 0.5, %v2666_v34  ;;  %v1548_v40 = vmul.f32 0.5, %v1491_v33  ;;  %v1495_v41 = vadd.f32 %v1494_v38, %v3173_v30  ;;  %v1635_v1 = vadd.f32 0.5, %v1603_v32 }
 0x2e0   : > { %2679 = vtanh.f32 %v1547_v37  ;;  %v1496_v3 = vpop.f32.mrf.mxu0  ;;  %v2668_v44 = vpop.eup %2667 }
 0x2e1   : > { %v1636_v42 = vadd.f32 0.5, %v1604_v39  ;;  %2681 = vtanh.f32 %v1548_v40  ;;  %v1549_v43 = vmul.f32 0.5, %v1495_v41  ;;  %v1497_v46 = vadd.f32 %v1496_v3, %v3176_v31 }
 0x2e2   : > { %v1498_v49 = vpop.f32.mrf.mxu0  ;;  %v2670_v52 = vpop.eup %2669  ;;  %v1663_v57 = vpack.c.bf16 %v1635_v1, %v1633_v45  ;;  %v1605_v61 = vmul.f32 0.5, %v2668_v44 }
 0x2e3   : > { %v1499_v53 = vadd.f32 %v1498_v49, %v3173_v30  ;;  %v1550_v55 = vmul.f32 0.5, %v1497_v46  ;;  %v1664_v56 = vpack.c.bf16 %v1636_v42, %v1634_v50  ;;  %2683 = vtanh.f32 %v1549_v43 }
 0x2e4   : > { %v2672_v54 = vpop.eup %2671  ;;  %v1500_v51 = vpop.f32.mrf.mxu0  ;;  %v1606_v62 = vmul.f32 0.5, %v2670_v52  ;;  %v1637_v11 = vadd.f32 0.5, %v1605_v61 }
 0x2e5   : > { %v1607_v58 = vmul.f32 0.5, %v2672_v54  ;;  %v1551_v59 = vmul.f32 0.5, %v1499_v53  ;;  %v1501_v60 = vadd.f32 %v1500_v51, %v3176_v31  ;;  %2685 = vtanh.f32 %v1550_v55  ;;  %1852 = vmatprep.mubr.bf16.mxu0 %v1664_v56 }
 0x2e6   : > { %v2674_v4 = vpop.eup %2673  ;;  %v1504_v63 = vpop.f32.mrf.mxu0  ;;  %1853 = vmatmul.mubr.bf16.gmra.mxu0 %v1663_v57  ;;  %v1638_v12 = vadd.f32 0.5, %v1606_v62 }
 0x2e7   : > { %v1608_v0 = vmul.f32 0.5, %v2674_v4  ;;  %2687 = vtanh.f32 %v1551_v59  ;;  %v1552_v2 = vmul.f32 0.5, %v1501_v60  ;;  %v1639_v6 = vadd.f32 0.5, %v1607_v58 }
 0x2e8   : > { %v1505_v7 = vadd.f32 %v1504_v63, %v3173_v30  ;;  %v1506_v8 = vpop.f32.mrf.mxu0 }
 0x2e9   : > { %v1640_v9 = vadd.f32 0.5, %v1608_v0  ;;  %2689 = vtanh.f32 %v1552_v2  ;;  %v1507_v10 = vadd.f32 %v1506_v8, %v3176_v31  ;;  %v1665_v19 = vpack.c.bf16 %v1639_v6, %v1637_v11 }
 0x2ea   : > { %v2676_v5 = vpop.eup %2675  ;;  %v1553_v13 = vmul.f32 0.5, %v1505_v7  ;;  %v1508_v14 = vpop.f32.mrf.mxu0 }
 0x2eb   : > { %v2678_v15 = vpop.eup %2677  ;;  %v1554_v47 = vmul.f32 0.5, %v1507_v10  ;;  %v1509_v16 = vadd.f32 %v1508_v14, %v3173_v30  ;;  %v1666_v18 = vpack.c.bf16 %v1640_v9, %v1638_v12  ;;  %v1610_v20 = vmul.f32 0.5, %v2676_v5 }
 0x2ec   : > { %v1510_v17 = vpop.f32.mrf.mxu0  ;;  %v1609_v24 = vmul.f32 0.5, %v2678_v15 }
 0x2ed   : > { %v2680_v48 = vpop.eup %2679  ;;  %2691 = vtanh.f32 %v1554_v47  ;;  %v1555_v21 = vmul.f32 0.5, %v1509_v16  ;;  %v1511_v22 = vadd.f32 %v1510_v17, %v3176_v31  ;;  %1860 = vmatprep.mubr.bf16.mxu0 %v1666_v18  ;;  %v1642_v34 = vadd.f32 0.5, %v1610_v20 }
 0x2ee   : > { %v2682_v23 = vpop.eup %2681  ;;  %v1611_v25 = vmul.f32 0.5, %v2680_v48  ;;  %2693 = vtanh.f32 %v1553_v13  ;;  %1861 = vmatmul.mubr.bf16.gmra.mxu0 %v1665_v19  ;;  %v1641_v38 = vadd.f32 0.5, %v1609_v24 }
 0x2ef   : > { %v1514_v26 = vpop.f32.mrf.mxu0  ;;  %v1612_v27 = vmul.f32 0.5, %v2682_v23  ;;  %2695 = vtanh.f32 %v1555_v21  ;;  %v1556_v28 = vmul.f32 0.5, %v1511_v22 }
 0x2f0   : > { %v1515_v29 = vadd.f32 %v1514_v26, %v3173_v30  ;;  %v1643_v32 = vadd.f32 0.5, %v1611_v25  ;;  %v2684_v37 = vpop.eup %2683 }
 0x2f1   : > { %v1516_v33 = vpop.f32.mrf.mxu0  ;;  %v1644_v35 = vadd.f32 0.5, %v1612_v27  ;;  %2697 = vtanh.f32 %v1556_v28  ;;  %v1613_v54 = vmul.f32 0.5, %v2684_v37 }
 0x2f2   : > { %v1557_v36 = vmul.f32 0.5, %v1515_v29  ;;  %v1517_v39 = vadd.f32 %v1516_v33, %v3176_v31  ;;  %v2686_v41 = vpop.eup %2685  ;;  %v1667_v43 = vpack.c.bf16 %v1643_v32, %v1641_v38 }
 0x2f3   : > { %v1518_v40 = vpop.f32.mrf.mxu0  ;;  %v1668_v3 = vpack.c.bf16 %v1644_v35, %v1642_v34  ;;  %v1614_v50 = vmul.f32 0.5, %v2686_v41  ;;  %v1645_v63 = vadd.f32 0.5, %v1613_v54 }
 0x2f4   : > { %v1519_v1 = vadd.f32 %v1518_v40, %v3173_v30  ;;  %v2688_v42 = vpop.eup %2687  ;;  %2699 = vtanh.f32 %v1557_v36  ;;  %v1558_v44 = vmul.f32 0.5, %v1517_v39 }
 0x2f5   : > { %v1520_v45 = vpop.f32.mrf.mxu0  ;;  %v1615_v46 = vmul.f32 0.5, %v2688_v42  ;;  %1868 = vmatprep.mubr.bf16.mxu1 %v1668_v3  ;;  %v1646_v60 = vadd.f32 0.5, %v1614_v50 }
 0x2f6   : > { %v1559_v49 = vmul.f32 0.5, %v1519_v1  ;;  %v1521_v52 = vadd.f32 %v1520_v45, %v3176_v31  ;;  %v2690_v53 = vpop.eup %2689  ;;  %2701 = vtanh.f32 %v1558_v44  ;;  %1869 = vmatmul.mubr.bf16.vlgmr.msra.gmra.mxu1 %v1667_v43 }
 0x2f7   : > { %v1524_v55 = vpop.f32.mrf.mxu0  ;;  %v1616_v51 = vmul.f32 0.5, %v2690_v53  ;;  %v1647_v57 = vadd.f32 0.5, %v1615_v46 }
 0x2f8   : > { %2703 = vtanh.f32 %v1559_v49  ;;  %v1560_v56 = vmul.f32 0.5, %v1521_v52  ;;  %v1525_v58 = vadd.f32 %v1524_v55, %v3173_v30 }
 0x2f9   : > { %v1526_v59 = vpop.f32.mrf.mxu0  ;;  %v1648_v4 = vadd.f32 0.5, %v1616_v51  ;;  %v1669_v11 = vpack.c.bf16 %v1647_v57, %v1645_v63 }
 0x2fa   : > { %2705 = vtanh.f32 %v1560_v56  ;;  %v1527_v61 = vadd.f32 %v1526_v59, %v3176_v31  ;;  %v2692_v62 = vpop.eup %2691  ;;  %v1561_v0 = vmul.f32 0.5, %v1525_v58  ;;  %v3213_v56 = vld [vmem:[%s3257_s8] ss:$0 sm:$0xff] }
 0x2fb   : > { %v1528_v2 = vpop.f32.mrf.mxu0  ;;  %v2694_v6 = vpop.eup %2693  ;;  %v1670_v9 = vpack.c.bf16 %v1648_v4, %v1646_v60  ;;  %v1618_v12 = vmul.f32 0.5, %v2692_v62 }
 0x2fc   : > { %v1562_v7 = vmul.f32 0.5, %v1527_v61  ;;  %v1529_v8 = vadd.f32 %v1528_v2, %v3173_v30  ;;  %v2696_v10 = vpop.eup %2695  ;;  %2707 = vtanh.f32 %v1561_v0  ;;  %v1617_v47 = vmul.f32 0.5, %v2694_v6 }
 0x2fd   : > { %v1530_v5 = vpop.f32.mrf.mxu0  ;;  %v1619_v13 = vmul.f32 0.5, %v2696_v10  ;;  %1876 = vmatprep.mubr.bf16.mxu1 %v1670_v9  ;;  %v1650_v48 = vadd.f32 0.5, %v1618_v12 }
 0x2fe   : > { %v1563_v14 = vmul.f32 0.5, %v1529_v8  ;;  %v2698_v15 = vpop.eup %2697  ;;  %2709 = vtanh.f32 %v1562_v7  ;;  %v1531_v16 = vadd.f32 %v1530_v5, %v3176_v31  ;;  %1877 = vmatmul.mubr.bf16.gmra.mxu1 %v1669_v11  ;;  %v1649_v21 = vadd.f32 0.5, %v1617_v47 }
 0x2ff   : > { %v1620_v17 = vmul.f32 0.5, %v2698_v15  ;;  %v1651_v18 = vadd.f32 0.5, %v1619_v13 }
 0x300   : > { %2711 = vtanh.f32 %v1563_v14  ;;  %v1564_v19 = vmul.f32 0.5, %v1531_v16 }
 0x301   : > { %v2700_v30 = vpop.eup %2699  ;;  %v1652_v20 = vadd.f32 0.5, %v1620_v17  ;;  %v1671_v25 = vpack.c.bf16 %v1651_v18, %v1649_v21 }
 0x302   : > { %2713 = vtanh.f32 %v1564_v19  ;;  %v1621_v29 = vmul.f32 0.5, %v2700_v30 }
 0x303   : > { %v2702_v22 = vpop.eup %2701  ;;  %v1672_v23 = vpack.c.bf16 %v1652_v20, %v1650_v48 }
 0x304   : > { %v1622_v26 = vmul.f32 0.5, %v2702_v22  ;;  %v1653_v36 = vadd.f32 0.5, %v1621_v29 }
 0x305   : > { %v2704_v24 = vpop.eup %2703  ;;  %1884 = vmatprep.mubr.bf16.mxu1 %v1672_v23 }
 0x306   : > { %v1623_v27 = vmul.f32 0.5, %v2704_v24  ;;  %1885 = vmatmul.mubr.bf16.gmra.mxu1 %v1671_v25  ;;  %v1654_v33 = vadd.f32 0.5, %v1622_v26 }
 0x307   : > { %v2706_v28 = vpop.eup %2705 }
 0x308   : > { %v1624_v31 = vmul.f32 0.5, %v2706_v28  ;;  %v1655_v32 = vadd.f32 0.5, %v1623_v27 }
 0x309   : > { %v2708_v35 = vpop.eup %2707 }
 0x30a   : > { %v1656_v34 = vadd.f32 0.5, %v1624_v31  ;;  %v1673_v40 = vpack.c.bf16 %v1655_v32, %v1653_v36  ;;  %v1625_v42 = vmul.f32 0.5, %v2708_v35 }
 0x30b   : > { %v2710_v37 = vpop.eup %2709 }
 0x30c   : > { %v1674_v38 = vpack.c.bf16 %v1656_v34, %v1654_v33  ;;  %v1626_v1 = vmul.f32 0.5, %v2710_v37  ;;  %v1657_v46 = vadd.f32 0.5, %v1625_v42 }
 0x30d   : > { %v2712_v39 = vpop.eup %2711 }
 0x30e   : > { %v1627_v41 = vmul.f32 0.5, %v2712_v39  ;;  %1892 = vmatprep.mubr.bf16.mxu1 %v1674_v38  ;;  %v1658_v45 = vadd.f32 0.5, %v1626_v1 }
 0x30f   : > { %1893 = vmatmul.mubr.bf16.gmra.mxu1 %v1673_v40  ;;  %v2714_v3 = vpop.eup %2713 }
 0x310   : > { %v1628_v43 = vmul.f32 0.5, %v2714_v3  ;;  %v1659_v44 = vadd.f32 0.5, %v1627_v41 }
 0x312   : > { %v1660_v50 = vadd.f32 0.5, %v1628_v43  ;;  %v1675_v52 = vpack.c.bf16 %v1659_v44, %v1657_v46 }
 0x314   : > { %v1676_v49 = vpack.c.bf16 %v1660_v50, %v1658_v45 }
 0x316   : > { %1900 = vmatprep.mubr.bf16.mxu1 %v1676_v49 }
 0x317   : > { %1901 = vmatmul.mubr.bf16.gmra.mxu1 %v1675_v52 }
 0x39e   : > { %v2289_v53 = vpop.f32.mrf.mxu0 }
 0x3a0   : > { %v2290_v54 = vpop.f32.mrf.mxu0 }
 0x3a1   : > { %v2291_v51 = vadd.f32 %v2290_v54, %v2289_v53 }
 0x3a2   : > { %v2292_v55 = vpop.f32.mrf.mxu0 }
 0x3a3   : > { %v1847_v59 = vadd.f32 %v2291_v51, %v3213_v56 }
 0x3a4   : > { %v2293_v57 = vpop.f32.mrf.mxu0 }
 0x3a5   : > { %v2294_v58 = vadd.f32 %v2293_v57, %v2292_v55 }
 0x3a6   : > { %v2295_v4 = vpop.f32.mrf.mxu0 }
 0x3a7   : > { %v1850_v60 = vadd.f32 %v2294_v58, %v3213_v56 }
 0x3a8   : > { %v2296_v62 = vpop.f32.mrf.mxu0 }
 0x3a9   : > { %v2229_v61 = vpack.c.bf16 %v1850_v60, %v1847_v59  ;;  %v2297_v0 = vadd.f32 %v2296_v62, %v2295_v4 }
 0x3aa   : > { %v2298_v63 = vpop.f32.mrf.mxu0 }
 0x3ab   : > { %2230 = vst [vmem:[%s3222_s22] sm:$0xff] %v2229_v61   ;;  %v1855_v8 = vadd.f32 %v2297_v0, %v3213_v56 }
 0x3ac   : > { %v2299_v2 = vpop.f32.mrf.mxu0 }
 0x3ad   : > { %v2300_v6 = vadd.f32 %v2299_v2, %v2298_v63 }
 0x3ae   : > { %v2301_v7 = vpop.f32.mrf.mxu0 }
 0x3af   : > { %v1858_v9 = vadd.f32 %v2300_v6, %v3213_v56 }
 0x3b0   : > { %v2302_v10 = vpop.f32.mrf.mxu0 }
 0x3b1   : > { %v2234_v5 = vpack.c.bf16 %v1858_v9, %v1855_v8  ;;  %v2303_v12 = vadd.f32 %v2302_v10, %v2301_v7 }
 0x3b2   : > { %v2304_v11 = vpop.f32.mrf.mxu0 }
 0x3b3   : > { %2266 = vst [vmem:[%s3222_s22 + $0x8] sm:$0xff] %v2234_v5   ;;  %v1863_v47 = vadd.f32 %v2303_v12, %v3213_v56 }
 0x3b4   : > { %v2305_v13 = vpop.f32.mrf.mxu0 }
 0x3b5   : > { %v2306_v14 = vadd.f32 %v2305_v13, %v2304_v11 }
 0x3b6   : > { %v2307_v15 = vpop.f32.mrf.mxu1 }
 0x3b7   : > { %v1866_v16 = vadd.f32 %v2306_v14, %v3213_v56 }
 0x3b8   : > { %v2308_v17 = vpop.f32.mrf.mxu1 }
 0x3b9   : > { %v2239_v18 = vpack.c.bf16 %v1866_v16, %v1863_v47  ;;  %v2309_v30 = vadd.f32 %v2308_v17, %v2307_v15 }
 0x3ba   : > { %v2310_v19 = vpop.f32.mrf.mxu1 }
 0x3bb   : > { %2267 = vst [vmem:[%s3222_s22 + $0x10] sm:$0xff] %v2239_v18   ;;  %v1871_v22 = vadd.f32 %v2309_v30, %v3213_v56 }
 0x3bc   : > { %v2311_v48 = vpop.f32.mrf.mxu1 }
 0x3bd   : > { %v2312_v20 = vadd.f32 %v2311_v48, %v2310_v19 }
 0x3be   : > { %v2313_v21 = vpop.f32.mrf.mxu1 }
 0x3bf   : > { %v1874_v23 = vadd.f32 %v2312_v20, %v3213_v56 }
 0x3c0   : > { %v2314_v24 = vpop.f32.mrf.mxu1 }
 0x3c1   : > { %v2244_v25 = vpack.c.bf16 %v1874_v23, %v1871_v22  ;;  %v2315_v27 = vadd.f32 %v2314_v24, %v2313_v21 }
 0x3c2   : > { %v2316_v26 = vpop.f32.mrf.mxu1 }
 0x3c3   : > { %2268 = vst [vmem:[%s3222_s22 + $0x18] sm:$0xff] %v2244_v25   ;;  %v1879_v32 = vadd.f32 %v2315_v27, %v3213_v56 }
 0x3c4   : > { %v2317_v28 = vpop.f32.mrf.mxu1 }
 0x3c5   : > { %v2318_v29 = vadd.f32 %v2317_v28, %v2316_v26 }
 0x3c6   : > { %v2319_v31 = vpop.f32.mrf.mxu1 }
 0x3c7   : > { %v1882_v33 = vadd.f32 %v2318_v29, %v3213_v56 }
 0x3c8   : > { %v2320_v34 = vpop.f32.mrf.mxu1 }
 0x3c9   : > { %v2249_v35 = vpack.c.bf16 %v1882_v33, %v1879_v32  ;;  %v2321_v37 = vadd.f32 %v2320_v34, %v2319_v31 }
 0x3ca   : > { %v2322_v36 = vpop.f32.mrf.mxu1 }
 0x3cb   : > { %2269 = vst [vmem:[%s3222_s22 + $0x20] sm:$0xff] %v2249_v35   ;;  %v1887_v41 = vadd.f32 %v2321_v37, %v3213_v56 }
 0x3cc   : > { %v2323_v38 = vpop.f32.mrf.mxu1 }
 0x3cd   : > { %v2324_v39 = vadd.f32 %v2323_v38, %v2322_v36 }
 0x3cf   : > { %v2325_v40 = vpop.f32.mrf.mxu1  ;;  %v1890_v1 = vadd.f32 %v2324_v39, %v3213_v56 }
 0x3d1   : > { %v2326_v3 = vpop.f32.mrf.mxu1  ;;  %v2254_v42 = vpack.c.bf16 %v1890_v1, %v1887_v41 }
 0x3d2   : > { %v2327_v44 = vadd.f32 %v2326_v3, %v2325_v40 }
 0x3d3   : > { %v2328_v43 = vpop.f32.mrf.mxu1  ;;  %2270 = vst [vmem:[%s3222_s22 + $0x28] sm:$0xff] %v2254_v42  }
 0x3d4   : > { %v1895_v46 = vadd.f32 %v2327_v44, %v3213_v56 }
 0x3d5   : > { %v2329_v45 = vpop.f32.mrf.mxu1 }
 0x3d6   : > { %v2330_v50 = vadd.f32 %v2329_v45, %v2328_v43 }
 0x3d7   : > { %v2331_v52 = vpop.f32.mrf.mxu1 }
 0x3d8   : > { %v1898_v49 = vadd.f32 %v2330_v50, %v3213_v56 }
 0x3d9   : > { %v2332_v54 = vpop.f32.mrf.mxu1 }
 0x3da   : > { %v2259_v53 = vpack.c.bf16 %v1898_v49, %v1895_v46  ;;  %v2333_v51 = vadd.f32 %v2332_v54, %v2331_v52 }
 0x3db   : > { %v2334_v55 = vpop.f32.mrf.mxu1 }
 0x3dc   : > { %2271 = vst [vmem:[%s3222_s22 + $0x30] sm:$0xff] %v2259_v53   ;;  %v1903_v59 = vadd.f32 %v2333_v51, %v3213_v56 }
 0x3dd   : > { %v2335_v57 = vpop.f32.mrf.mxu1 }
 0x3de   : > { %v2336_v58 = vadd.f32 %v2335_v57, %v2334_v55 }
 0x3e0   : > { %v1906_v60 = vadd.f32 %v2336_v58, %v3213_v56 }
 0x3e2   : > { %v2264_v4 = vpack.c.bf16 %v1906_v60, %v1903_v59 }
 0x3e4   : > { %2272 = vst [vmem:[%s3222_s22 + $0x38] sm:$0xff] %v2264_v4  }
 0x3e5 PF: > { %s21_s30 = sadd.s32 1, %s2807_s30  }
 0x3e6   : > { %p18_p2 = scmp.ge.s32.totalorder %s21_s30, 4  }
 0x3e8   :  { %20 = sbr.rel (!%p18_p2) target bundleno = 2 (0x2), region = 99 }
 0x3ed   :  { %2011 = vsyncpa [#allocation3], 1 }
 0x3ee   :  { %2013 = vsyncpa [#allocation3 + $0x1], 1 }
 0x3ef   :  { %2014 = vsyncpa [#allocation5], 1 }

</bundles_post_ra>
